<compile_context>
chip_gen: v7x
topology: tpu7x:2x2x1
jax: 0.10.0
libtpu: 0.0.40
codegen_flags: <defaults>
</compile_context>

<pallas_src>
import functools

import numpy as np
import jax
import jax.numpy as jnp
from jax.experimental import pallas as pl
from jax.experimental.pallas import tpu as pltpu


def _round_up(x, m):
    return (x + m - 1) // m * m


# ----------------------------- Pallas kernel --------------------------------
def ntm_extractor_kernel(imgs_ref, ind_ref,
                         w_bb_ref, b_bb_ref,
                         w_dis_ref, b_dis_ref,
                         w_key_ref, b_key_ref,
                         mem_ref,
                         w_res_ref, b_res_ref,
                         out_ref,
                         gap_acc_ref,
                         *, inv_hw):
    """grid = (batch_tiles, hw_tiles); hw is the sequential reduction axis.

    hw steps 0..last : accumulate the spatial sum of the image tile (GAP).
    hw step  last    : finish the GAP and run the dense chain (backbone linear +
                       ReLU, disentangle linears, NTM addressing/read/output
                       linear), writing feat_manip = dis_cat + residual.
    """
    hw_id = pl.program_id(1)

    # ---- init the GAP accumulator on the first spatial step -----------------
    @pl.when(hw_id == 0)
    def _():
        gap_acc_ref[...] = jnp.zeros_like(gap_acc_ref)

    # ---- partial spatial sum: images arrive as bf16, accumulate in f32 ------
    tile = imgs_ref[...].astype(jnp.float32)                     # [tb, C, thw]
    gap_acc_ref[...] += jnp.sum(tile, axis=-1)                   # [tb, C]

    # ---- dense chain only on the last spatial step ---------------------------
    @pl.when(hw_id == pl.num_programs(1) - 1)
    def _():
        bf16, f32 = jnp.bfloat16, jnp.float32
        # true mean: zero spatial padding contributes nothing to the sum.
        pooled = gap_acc_ref[...] * inv_hw                       # [tb, C] f32

        # model_feature: backbone Linear + ReLU, stacked per-attribute
        # disentangle linears folded into one matmul (== torch.cat(dis_feat, 1)).
        feat = jnp.dot(pooled.astype(bf16), w_bb_ref[...],
                       preferred_element_type=f32) + b_bb_ref[...]
        feat = jnp.maximum(feat, 0.0)                            # [tb, hidden]
        dis_cat = jnp.dot(feat.astype(bf16), w_dis_ref[...],
                          preferred_element_type=f32) + b_dis_ref[...]   # [tb, AD]

        # manipulate_ntm(indicator): controller key -> softmax addressing over
        # memory -> read -> output linear (residual feature).
        key = jnp.tanh(jnp.dot(ind_ref[...].astype(bf16), w_key_ref[...],
                               preferred_element_type=f32) + b_key_ref[...])
        mem = mem_ref[...]                                       # [S, K] bf16
        scores = jax.lax.dot_general(key.astype(bf16), mem,
                                     (((1,), (1,)), ((), ())),
                                     preferred_element_type=f32)  # [tb, S]
        scores = scores - jnp.max(scores, axis=-1, keepdims=True)
        p = jnp.exp(scores)                                      # unnormalised
        denom = jnp.sum(p, axis=-1, keepdims=True)               # [tb, 1]
        read = jnp.dot(p.astype(bf16), mem,
                       preferred_element_type=f32)               # [tb, K]
        residual = jnp.dot(read.astype(bf16), w_res_ref[...],
                           preferred_element_type=f32)           # [tb, AD]
        # softmax normalisation deferred to the narrow [tb, AD] tensor.
        # (pl.reciprocal(..., approx=True) would move this to the EUP slot;
        #  kept exact here to hold a tight verification tolerance.)
        residual = residual * pl.reciprocal(denom) + b_res_ref[...]

        # feat_manip = torch.cat(dis_feat, 1) + residual_feat
        out_ref[...] = (dis_cat + residual).astype(out_ref.dtype)


# ------------------------------ wrapper --------------------------------------
def _const_spec(x):
    nd = x.ndim
    return pl.BlockSpec(x.shape, lambda bi, hi, _nd=nd: (0,) * _nd)


def ntm_extractor_forward(indicator, imgs, params, train=False, *,
                          batch_tile=8, hw_tile_target=512,
                          imgs_vmem_budget=8 << 20):
    """Eval-path forward of NTM_extractor. Returns the module's 5-tuple:
    (feat_manip, input_memory, feats, cls_outs, cls_outs_manip)."""
    # TODO(synk): train branch (per-key feature dicts, optimizer step inside
    #             manipulate_ntm, train_loader) is not implemented.
    assert not train, "only the inference path is implemented"

    B, C, H, W = imgs.shape
    HW = H * W
    hidden = params["w_bb"].shape[1]
    AD = params["w_dis"].shape[1]
    ind_dim, key_dim = params["w_key"].shape
    S = params["memory"].shape[0]
    itemsize = jnp.dtype(imgs.dtype).itemsize

    # ---- tile selection ------------------------------------------------------
    tb = min(batch_tile, B)
    thw_full = _round_up(HW, 128)
    if thw_full <= hw_tile_target:
        thw = thw_full
    else:
        # >=512 lanes per image tile (HBM roofline knee) but keep the
        # double-buffered tile well inside even v5e's 16 MiB scoped-VMEM default
        # (v7x has only 64 MiB physical VMEM).
        by_budget = max(128, (imgs_vmem_budget // (2 * tb * C * itemsize)) // 128 * 128)
        thw = int(min(thw_full, min(hw_tile_target, by_budget)))
    B_pad = _round_up(B, tb)
    HW_pad = _round_up(HW, thw)

    # images stay in their native (bf16) dtype — no wrapper-side f32 copy.
    # Zero padding of batch/spatial is harmless: the kernel accumulates a SUM
    # and divides by the true H*W; padded batch rows are sliced off below.
    imgs_flat = imgs.reshape(B, C, HW)
    ind = indicator
    if HW_pad != HW:
        imgs_flat = jnp.pad(imgs_flat, ((0, 0), (0, 0), (0, HW_pad - HW)))
    if B_pad != B:
        imgs_flat = jnp.pad(imgs_flat, ((0, B_pad - B), (0, 0), (0, 0)))
        ind = jnp.pad(ind, ((0, B_pad - B), (0, 0)))

    grid = (B_pad // tb, HW_pad // thw)

    operands = (
        imgs_flat, ind,
        params["w_bb"], params["b_bb"],
        params["w_dis"], params["b_dis"],
        params["w_key"], params["b_key"],
        params["memory"],
        params["w_res"], params["b_res"],
    )

    in_specs = [
        pl.BlockSpec((tb, C, thw), lambda bi, hi: (bi, 0, hi)),    # streamed image tiles
        pl.BlockSpec((tb, ind_dim), lambda bi, hi: (bi, 0)),       # indicator rows
    ] + [_const_spec(x) for x in operands[2:]]                     # weights: VMEM-resident

    out_spec = pl.BlockSpec((tb, AD), lambda bi, hi: (bi, 0))

    # advisory hint for XLA's scheduler: bytes dominated by the image stream.
    flops = (B_pad * C * HW_pad
             + 2 * B_pad * (C * hidden + hidden * AD + ind_dim * key_dim
                            + 2 * key_dim * S + key_dim * AD))
    bytes_accessed = (sum(int(np.prod(x.shape)) * jnp.dtype(x.dtype).itemsize
                          for x in operands)
                      + B_pad * AD * 4)
    cost = pl.CostEstimate(flops=int(flops),
                           transcendentals=int(B_pad * (key_dim + S)),
                           bytes_accessed=int(bytes_accessed))

    feat_manip = pl.pallas_call(
        functools.partial(ntm_extractor_kernel, inv_hw=1.0 / float(HW)),
        out_shape=jax.ShapeDtypeStruct((B_pad, AD), jnp.float32),
        grid_spec=pltpu.PrefetchScalarGridSpec(
            num_scalar_prefetch=0,
            grid=grid,
            in_specs=in_specs,
            out_specs=out_spec,
            scratch_shapes=[pltpu.VMEM((tb, C), jnp.float32)]),     # GAP accumulator
        compiler_params=pltpu.CompilerParams(
            # batch tiles shard across the two TensorCores on v7x; the spatial
            # axis is the sequential GAP reduction (accumulator pattern).
            dimension_semantics=("parallel", "arbitrary")),
        cost_estimate=cost,
    )(*operands)

    if B_pad != B:
        feat_manip = feat_manip[:B]

    input_memory = None
    feats, cls_outs, cls_outs_manip = [], [], []
    return feat_manip, input_memory, feats, cls_outs, cls_outs_manip


# ------------------------------ reference ------------------------------------
def ntm_extractor_reference(indicator, imgs, params):
    """Pure-JAX reference, precision-matched to the kernel (same bf16 cast points,
    f32 accumulation, deferred softmax normalisation)."""
    f32, bf16 = jnp.float32, jnp.bfloat16
    B, C, H, W = imgs.shape
    w = {k: v.astype(f32) for k, v in params.items()}

    pooled = jnp.mean(imgs.reshape(B, C, H * W).astype(f32), axis=-1)
    feat = jnp.maximum(pooled.astype(bf16).astype(f32) @ w["w_bb"] + w["b_bb"], 0.0)
    dis_cat = feat.astype(bf16).astype(f32) @ w["w_dis"] + w["b_dis"]

    key = jnp.tanh(indicator.astype(f32) @ w["w_key"] + w["b_key"])
    scores = key.astype(bf16).astype(f32) @ w["memory"].T
    scores = scores - jnp.max(scores, axis=-1, keepdims=True)
    p = jnp.exp(scores)
    denom = jnp.sum(p, axis=-1, keepdims=True)
    read = p.astype(bf16).astype(f32) @ w["memory"]
    residual = (read.astype(bf16).astype(f32) @ w["w_res"]) / denom + w["b_res"]
    return dis_cat + residual


# -------------------------------- main ----------------------------------------
if __name__ == "__main__":
    # Small but lane-friendly shapes: feature dims are multiples of 128, the
    # batch fills f32 sublanes, and H*W = 1024 exercises two 512-lane GAP tiles.
    B, C, H, W = 16, 16, 32, 32        # images, NCHW
    hidden = 128                       # backbone feature size
    n_attrs, dim_chunk = 4, 32         # attribute-specific embeddings -> A*D = 128
    AD = n_attrs * dim_chunk
    ind_opts = 3                       # per-attribute manipulation options
    ind_dim = n_attrs * ind_opts
    mem_slots, key_dim = 128, 128      # NTM memory

    root = jax.random.PRNGKey(0)
    ks = jax.random.split(root, 12)

    # images ship as bf16; the kernel casts to f32 after the DMA (halves HBM reads)
    imgs = jax.random.normal(ks[0], (B, C, H, W), dtype=jnp.bfloat16)
    # indicator: one-hot manipulation code per attribute, flattened to [B, A*3]
    choices = jax.random.randint(ks[1], (B, n_attrs), 0, ind_opts)
    indicator = jax.nn.one_hot(choices, ind_opts, dtype=jnp.float32).reshape(B, ind_dim)

    def init_w(k, shape, scale=0.1):
        # weights / memory in bf16 (native MXU input); f32 accumulation on the MXU
        return (scale * jax.random.normal(k, shape, dtype=jnp.float32)).astype(jnp.bfloat16)

    def init_b(k, shape, scale=0.1):
        # biases stay f32 (added to f32 accumulators)
        return scale * jax.random.normal(k, shape, dtype=jnp.float32)

    params = {
        "w_bb":  init_w(ks[2], (C, hidden)),
        "b_bb":  init_b(ks[3], (1, hidden)),
        "w_dis": init_w(ks[4], (hidden, AD)),
        "b_dis": init_b(ks[5], (1, AD)),
        "w_key": init_w(ks[6], (ind_dim, key_dim)),
        "b_key": init_b(ks[7], (1, key_dim)),
        "memory": init_w(ks[8], (mem_slots, key_dim), scale=1.0),
        "w_res": init_w(ks[9], (key_dim, AD)),
        "b_res": init_b(ks[10], (1, AD)),
    }

    feat_manip, input_memory, feats, cls_outs, cls_outs_manip = ntm_extractor_forward(
        indicator, imgs, params, train=False)
    feat_manip = jax.block_until_ready(feat_manip)

    ref = ntm_extractor_reference(indicator, imgs, params)
    # precision-matched reference: tolerance only has to absorb MXU accumulation
    # order and the occasional 1-ulp bf16 cast difference vs. the XLA reference.
    np.testing.assert_allclose(np.asarray(feat_manip),
                               np.asarray(ref, dtype=np.float32),
                               rtol=5e-3, atol=5e-3)
    assert feat_manip.shape == (B, AD)
    print("KERNEL_OK")
</pallas_src>

<mosaic_0001>
module attributes {stable_mosaic.version = 11 : i64} {
  func.func @ntm_extractor_kernel(%arg0: i32, %arg1: i32, %arg2: memref<8x16x512xbf16, #tpu.memory_space<vmem>>, %arg3: memref<8x12xf32, #tpu.memory_space<vmem>>, %arg4: memref<16x128xbf16, #tpu.memory_space<vmem>>, %arg5: memref<1x128xf32, #tpu.memory_space<vmem>>, %arg6: memref<128x128xbf16, #tpu.memory_space<vmem>>, %arg7: memref<1x128xf32, #tpu.memory_space<vmem>>, %arg8: memref<12x128xbf16, #tpu.memory_space<vmem>>, %arg9: memref<1x128xf32, #tpu.memory_space<vmem>>, %arg10: memref<128x128xbf16, #tpu.memory_space<vmem>>, %arg11: memref<128x128xbf16, #tpu.memory_space<vmem>>, %arg12: memref<1x128xf32, #tpu.memory_space<vmem>>, %arg13: memref<8x128xf32, #tpu.memory_space<vmem>>, %arg14: memref<8x16xf32, #tpu.memory_space<vmem>>) attributes {dimension_semantics = [#tpu.dimension_semantics<parallel>, #tpu.dimension_semantics<arbitrary>], iteration_bounds = array<i64: 2, 2>, scalar_prefetch = 0 : i64, scratch_operands = 1 : i64, tpu.core_type = #tpu.core_type<tc>, window_params = [{transform_indices = @transform_0, window_bounds = array<i64: 8, 16, 512>}, {transform_indices = @transform_1, window_bounds = array<i64: 8, 12>}, {pipeline_mode = #tpu.pipeline_mode<synchronous>, transform_indices = @transform_2, window_bounds = array<i64: 16, 128>}, {pipeline_mode = #tpu.pipeline_mode<synchronous>, transform_indices = @transform_3, window_bounds = array<i64: 1, 128>}, {pipeline_mode = #tpu.pipeline_mode<synchronous>, transform_indices = @transform_4, window_bounds = array<i64: 128, 128>}, {pipeline_mode = #tpu.pipeline_mode<synchronous>, transform_indices = @transform_5, window_bounds = array<i64: 1, 128>}, {pipeline_mode = #tpu.pipeline_mode<synchronous>, transform_indices = @transform_6, window_bounds = array<i64: 12, 128>}, {pipeline_mode = #tpu.pipeline_mode<synchronous>, transform_indices = @transform_7, window_bounds = array<i64: 1, 128>}, {pipeline_mode = #tpu.pipeline_mode<synchronous>, transform_indices = @transform_8, window_bounds = array<i64: 128, 128>}, {pipeline_mode = #tpu.pipeline_mode<synchronous>, transform_indices = @transform_9, window_bounds = array<i64: 128, 128>}, {pipeline_mode = #tpu.pipeline_mode<synchronous>, transform_indices = @transform_10, window_bounds = array<i64: 1, 128>}, {transform_indices = @transform_11, window_bounds = array<i64: 8, 128>}]} {
    %c0_i32 = arith.constant 0 : i32
    %0 = arith.cmpi eq, %arg1, %c0_i32 : i32
    %1 = arith.extui %0 : i1 to i32
    %c0_i32_0 = arith.constant 0 : i32
    %2 = arith.cmpi ne, %1, %c0_i32_0 : i32
    scf.if %2 {
      %cst_8 = arith.constant 0.000000e+00 : f32
      %12 = vector.broadcast %cst_8 : f32 to vector<8x16xf32>
      %c0_9 = arith.constant 0 : index
      %c0_10 = arith.constant 0 : index
      %13 = vector.load %arg14[%c0_9, %c0_10] : memref<8x16xf32, #tpu.memory_space<vmem>>, vector<8x16xf32>
      tpu.vector_store %arg14[%c0_9, %c0_10], %12 {strides = array<i32>} : memref<8x16xf32, #tpu.memory_space<vmem>>, vector<8x16xf32>,
    } else {
    }
    %c0 = arith.constant 0 : index
    %c0_1 = arith.constant 0 : index
    %c0_2 = arith.constant 0 : index
    %3 = vector.load %arg2[%c0, %c0_1, %c0_2] : memref<8x16x512xbf16, #tpu.memory_space<vmem>>, vector<8x16x512xbf16>
    %4 = arith.extf %3 : vector<8x16x512xbf16> to vector<8x16x512xf32>
    %c0_3 = arith.constant 0 : index
    %c0_4 = arith.constant 0 : index
    %5 = vector.load %arg14[%c0_3, %c0_4] : memref<8x16xf32, #tpu.memory_space<vmem>>, vector<8x16xf32>
    %cst = arith.constant dense<0.000000e+00> : vector<8x16xf32>
    %6 = vector.multi_reduction <add>, %4, %cst [2] : vector<8x16x512xf32> to vector<8x16xf32>
    %7 = arith.addf %5, %6 : vector<8x16xf32>
    %c0_5 = arith.constant 0 : index
    %c0_6 = arith.constant 0 : index
    %8 = vector.load %arg14[%c0_5, %c0_6] : memref<8x16xf32, #tpu.memory_space<vmem>>, vector<8x16xf32>
    tpu.vector_store %arg14[%c0_5, %c0_6], %7 {strides = array<i32>} : memref<8x16xf32, #tpu.memory_space<vmem>>, vector<8x16xf32>,
    %c1_i32 = arith.constant 1 : i32
    %9 = arith.cmpi eq, %arg1, %c1_i32 : i32
    %10 = arith.extui %9 : i1 to i32
    %c0_i32_7 = arith.constant 0 : i32
    %11 = arith.cmpi ne, %10, %c0_i32_7 : i32
    scf.if %11 {
      %c0_8 = arith.constant 0 : index
      %c0_9 = arith.constant 0 : index
      %12 = vector.load %arg14[%c0_8, %c0_9] : memref<8x16xf32, #tpu.memory_space<vmem>>, vector<8x16xf32>
      %cst_10 = arith.constant 9.765625E-4 : f32
      %13 = vector.broadcast %cst_10 : f32 to vector<8x16xf32>
      %14 = arith.mulf %12, %13 : vector<8x16xf32>
      %15 = arith.truncf %14 : vector<8x16xf32> to vector<8x16xbf16>
      %c0_11 = arith.constant 0 : index
      %c0_12 = arith.constant 0 : index
      %16 = vector.load %arg4[%c0_11, %c0_12] : memref<16x128xbf16, #tpu.memory_space<vmem>>, vector<16x128xbf16>
      %cst_13 = arith.constant dense<0.000000e+00> : vector<8x128xf32>
      %17 = tpu.matmul %15, %16, %cst_13 {dimension_numbers = #tpu.dot_dimension_numbers<[1], [0], [0], [1], [0, 0, 1, 1], [], []>} : vector<8x16xbf16>, vector<16x128xbf16>, vector<8x128xf32> -> vector<8x128xf32>
      %c0_14 = arith.constant 0 : index
      %c0_15 = arith.constant 0 : index
      %18 = vector.load %arg5[%c0_14, %c0_15] : memref<1x128xf32, #tpu.memory_space<vmem>>, vector<1x128xf32>
      %19 = vector.broadcast %18 : vector<1x128xf32> to vector<8x128xf32>
      %20 = arith.addf %17, %19 : vector<8x128xf32>
      %cst_16 = arith.constant 0.000000e+00 : f32
      %21 = vector.broadcast %cst_16 : f32 to vector<8x128xf32>
      %22 = arith.maximumf %20, %21 : vector<8x128xf32>
      %23 = arith.truncf %22 : vector<8x128xf32> to vector<8x128xbf16>
      %c0_17 = arith.constant 0 : index
      %c0_18 = arith.constant 0 : index
      %24 = vector.load %arg6[%c0_17, %c0_18] : memref<128x128xbf16, #tpu.memory_space<vmem>>, vector<128x128xbf16>
      %cst_19 = arith.constant dense<0.000000e+00> : vector<8x128xf32>
      %25 = tpu.matmul %23, %24, %cst_19 {dimension_numbers = #tpu.dot_dimension_numbers<[1], [0], [0], [1], [0, 0, 1, 1], [], []>} : vector<8x128xbf16>, vector<128x128xbf16>, vector<8x128xf32> -> vector<8x128xf32>
      %c0_20 = arith.constant 0 : index
      %c0_21 = arith.constant 0 : index
      %26 = vector.load %arg7[%c0_20, %c0_21] : memref<1x128xf32, #tpu.memory_space<vmem>>, vector<1x128xf32>
      %27 = vector.broadcast %26 : vector<1x128xf32> to vector<8x128xf32>
      %28 = arith.addf %25, %27 : vector<8x128xf32>
      %c0_22 = arith.constant 0 : index
      %c0_23 = arith.constant 0 : index
      %29 = vector.load %arg3[%c0_22, %c0_23] : memref<8x12xf32, #tpu.memory_space<vmem>>, vector<8x12xf32>
      %30 = arith.truncf %29 : vector<8x12xf32> to vector<8x12xbf16>
      %c0_24 = arith.constant 0 : index
      %c0_25 = arith.constant 0 : index
      %31 = vector.load %arg8[%c0_24, %c0_25] : memref<12x128xbf16, #tpu.memory_space<vmem>>, vector<12x128xbf16>
      %cst_26 = arith.constant dense<0.000000e+00> : vector<8x128xf32>
      %32 = tpu.matmul %30, %31, %cst_26 {dimension_numbers = #tpu.dot_dimension_numbers<[1], [0], [0], [1], [0, 0, 1, 1], [], []>} : vector<8x12xbf16>, vector<12x128xbf16>, vector<8x128xf32> -> vector<8x128xf32>
      %c0_27 = arith.constant 0 : index
      %c0_28 = arith.constant 0 : index
      %33 = vector.load %arg9[%c0_27, %c0_28] : memref<1x128xf32, #tpu.memory_space<vmem>>, vector<1x128xf32>
      %34 = vector.broadcast %33 : vector<1x128xf32> to vector<8x128xf32>
      %35 = arith.addf %32, %34 : vector<8x128xf32>
      %36 = math.tanh %35 : vector<8x128xf32>
      %c0_29 = arith.constant 0 : index
      %c0_30 = arith.constant 0 : index
      %37 = vector.load %arg10[%c0_29, %c0_30] : memref<128x128xbf16, #tpu.memory_space<vmem>>, vector<128x128xbf16>
      %38 = arith.truncf %36 : vector<8x128xf32> to vector<8x128xbf16>
      %cst_31 = arith.constant dense<0.000000e+00> : vector<8x128xf32>
      %39 = tpu.matmul %38, %37, %cst_31 {dimension_numbers = #tpu.dot_dimension_numbers<[1], [1], [0], [0], [0, 0, 1, 0], [], []>} : vector<8x128xbf16>, vector<128x128xbf16>, vector<8x128xf32> -> vector<8x128xf32>
      %cst_32 = arith.constant dense<0xFF800000> : vector<8xf32>
      %40 = vector.multi_reduction <maximumf>, %39, %cst_32 [1] : vector<8x128xf32> to vector<8xf32>
      %41 = vector.shape_cast %40 : vector<8xf32> to vector<8x1xf32>
      %42 = vector.broadcast %41 : vector<8x1xf32> to vector<8x128xf32>
      %43 = arith.subf %39, %42 : vector<8x128xf32>
      %44 = math.exp %43 : vector<8x128xf32>
      %cst_33 = arith.constant dense<0.000000e+00> : vector<8xf32>
      %45 = vector.multi_reduction <add>, %44, %cst_33 [1] : vector<8x128xf32> to vector<8xf32>
      %46 = vector.shape_cast %45 : vector<8xf32> to vector<8x1xf32>
      %47 = arith.truncf %44 : vector<8x128xf32> to vector<8x128xbf16>
      %cst_34 = arith.constant dense<0.000000e+00> : vector<8x128xf32>
      %48 = tpu.matmul %47, %37, %cst_34 {dimension_numbers = #tpu.dot_dimension_numbers<[1], [0], [0], [1], [0, 0, 1, 1], [], []>} : vector<8x128xbf16>, vector<128x128xbf16>, vector<8x128xf32> -> vector<8x128xf32>
      %49 = arith.truncf %48 : vector<8x128xf32> to vector<8x128xbf16>
      %c0_35 = arith.constant 0 : index
      %c0_36 = arith.constant 0 : index
      %50 = vector.load %arg11[%c0_35, %c0_36] : memref<128x128xbf16, #tpu.memory_space<vmem>>, vector<128x128xbf16>
      %cst_37 = arith.constant dense<0.000000e+00> : vector<8x128xf32>
      %51 = tpu.matmul %49, %50, %cst_37 {dimension_numbers = #tpu.dot_dimension_numbers<[1], [0], [0], [1], [0, 0, 1, 1], [], []>} : vector<8x128xbf16>, vector<128x128xbf16>, vector<8x128xf32> -> vector<8x128xf32>
      %52 = tpu.reciprocal %46 : vector<8x1xf32> -> vector<8x1xf32>
      %53 = vector.broadcast %52 : vector<8x1xf32> to vector<8x128xf32>
      %54 = arith.mulf %51, %53 : vector<8x128xf32>
      %c0_38 = arith.constant 0 : index
      %c0_39 = arith.constant 0 : index
      %55 = vector.load %arg12[%c0_38, %c0_39] : memref<1x128xf32, #tpu.memory_space<vmem>>, vector<1x128xf32>
      %56 = vector.broadcast %55 : vector<1x128xf32> to vector<8x128xf32>
      %57 = arith.addf %54, %56 : vector<8x128xf32>
      %58 = arith.addf %28, %57 : vector<8x128xf32>
      %c0_40 = arith.constant 0 : index
      %c0_41 = arith.constant 0 : index
      %59 = vector.load %arg13[%c0_40, %c0_41] : memref<8x128xf32, #tpu.memory_space<vmem>>, vector<8x128xf32>
      tpu.vector_store %arg13[%c0_40, %c0_41], %58 {strides = array<i32>} : memref<8x128xf32, #tpu.memory_space<vmem>>, vector<8x128xf32>,
    } else {
    }
    return
  }
  func.func @transform_0(%arg0: i32, %arg1: i32) -> (i32, i32, i32) {
    %c0_i32 = arith.constant 0 : i32
    %c0_i32_0 = arith.constant 0 : i32
    return %arg0, %c0_i32, %arg1 : i32, i32, i32
  }
  func.func @transform_1(%arg0: i32, %arg1: i32) -> (i32, i32) {
    %c0_i32 = arith.constant 0 : i32
    %c0_i32_0 = arith.constant 0 : i32
    return %arg0, %c0_i32 : i32, i32
  }
  func.func @transform_2(%arg0: i32, %arg1: i32) -> (i32, i32) {
    %c0_i32 = arith.constant 0 : i32
    %c0_i32_0 = arith.constant 0 : i32
    %c0_i32_1 = arith.constant 0 : i32
    return %c0_i32, %c0_i32_0 : i32, i32
  }
  func.func @transform_3(%arg0: i32, %arg1: i32) -> (i32, i32) {
    %c0_i32 = arith.constant 0 : i32
    %c0_i32_0 = arith.constant 0 : i32
    %c0_i32_1 = arith.constant 0 : i32
    return %c0_i32, %c0_i32_0 : i32, i32
  }
  func.func @transform_4(%arg0: i32, %arg1: i32) -> (i32, i32) {
    %c0_i32 = arith.constant 0 : i32
    %c0_i32_0 = arith.constant 0 : i32
    %c0_i32_1 = arith.constant 0 : i32
    return %c0_i32, %c0_i32_0 : i32, i32
  }
  func.func @transform_5(%arg0: i32, %arg1: i32) -> (i32, i32) {
    %c0_i32 = arith.constant 0 : i32
    %c0_i32_0 = arith.constant 0 : i32
    %c0_i32_1 = arith.constant 0 : i32
    return %c0_i32, %c0_i32_0 : i32, i32
  }
  func.func @transform_6(%arg0: i32, %arg1: i32) -> (i32, i32) {
    %c0_i32 = arith.constant 0 : i32
    %c0_i32_0 = arith.constant 0 : i32
    %c0_i32_1 = arith.constant 0 : i32
    return %c0_i32, %c0_i32_0 : i32, i32
  }
  func.func @transform_7(%arg0: i32, %arg1: i32) -> (i32, i32) {
    %c0_i32 = arith.constant 0 : i32
    %c0_i32_0 = arith.constant 0 : i32
    %c0_i32_1 = arith.constant 0 : i32
    return %c0_i32, %c0_i32_0 : i32, i32
  }
  func.func @transform_8(%arg0: i32, %arg1: i32) -> (i32, i32) {
    %c0_i32 = arith.constant 0 : i32
    %c0_i32_0 = arith.constant 0 : i32
    %c0_i32_1 = arith.constant 0 : i32
    return %c0_i32, %c0_i32_0 : i32, i32
  }
  func.func @transform_9(%arg0: i32, %arg1: i32) -> (i32, i32) {
    %c0_i32 = arith.constant 0 : i32
    %c0_i32_0 = arith.constant 0 : i32
    %c0_i32_1 = arith.constant 0 : i32
    return %c0_i32, %c0_i32_0 : i32, i32
  }
  func.func @transform_10(%arg0: i32, %arg1: i32) -> (i32, i32) {
    %c0_i32 = arith.constant 0 : i32
    %c0_i32_0 = arith.constant 0 : i32
    %c0_i32_1 = arith.constant 0 : i32
    return %c0_i32, %c0_i32_0 : i32, i32
  }
  func.func @transform_11(%arg0: i32, %arg1: i32) -> (i32, i32) {
    %c0_i32 = arith.constant 0 : i32
    %c0_i32_0 = arith.constant 0 : i32
    return %arg0, %c0_i32 : i32, i32
  }
}

</mosaic_0001>

<bundles_post_ra>
// kernel: tpu_custom_call.1
= control target key start
LH: loop header
LB: loop body
LE: loop exit
PB: predicated region body
PF: predicated region fallthrough
CT: control target
= control target key end

     0   :  { %s2790_s0 = inlined_call_operand.hbm [shape: bf16[16,16,1024], index: 0, kind: input, shape index: {}]   ;;  %s2791_s1 = inlined_call_operand.hbm [shape: f32[16,12], index: 1, kind: input, shape index: {}]   ;;  %s2792_s2 = inlined_call_operand.hbm [shape: bf16[16,128], index: 2, kind: input, shape index: {}]   ;;  %s2793_s3 = inlined_call_operand.vmem [shape: f32[1,128], index: 3, kind: input, shape index: {}]   ;;  %s2794_s4 = inlined_call_operand.hbm [shape: bf16[128,128], index: 4, kind: input, shape index: {}]   ;;  %s2795_s5 = inlined_call_operand.vmem [shape: f32[1,128], index: 5, kind: input, shape index: {}]   ;;  %s2796_s6 = inlined_call_operand.vmem [shape: bf16[12,128], index: 6, kind: input, shape index: {}]   ;;  %s2797_s7 = inlined_call_operand.vmem [shape: f32[1,128], index: 7, kind: input, shape index: {}]   ;;  %s2798_s8 = inlined_call_operand.hbm [shape: bf16[128,128], index: 8, kind: input, shape index: {}]   ;;  %s2799_s9 = inlined_call_operand.hbm [shape: bf16[128,128], index: 9, kind: input, shape index: {}]   ;;  %s2800_s10 = inlined_call_operand.vmem [shape: f32[1,128], index: 10, kind: input, shape index: {}]   ;;  %s2801_s11 = inlined_call_operand.hbm [shape: f32[16,128], index: 11, kind: output, shape index: {}]  }
   0x1   :  { %2811 = sst [smem:[#allocation25_spill]] %s2790_s0 }
   0x2   :  { %2812 = sst [smem:[#allocation26_spill]] %s2792_s2 }
   0x3   :  { %2813 = sst [smem:[#allocation27_spill]] %s2793_s3 }
   0x4   :  { %2814 = sst [smem:[#allocation28_spill]] %s2794_s4 }
   0x5   :  { %2815 = sst [smem:[#allocation29_spill]] %s2795_s5 }
   0x6   :  { %2816 = sst [smem:[#allocation30_spill]] %s2796_s6 }
   0x7   :  { %2817 = sst [smem:[#allocation31_spill]] %s2797_s7 }
   0x8   :  { %2818 = sst [smem:[#allocation32_spill]] %s2798_s8 }
   0x9   :  { %2819 = sst [smem:[#allocation33_spill]] %s2800_s10 }
   0xa   :  { %2820 = sst [smem:[#allocation34_spill]] %s2801_s11 }
   0xb   :  { %16 = vsyncpa [#allocation4], 0 }
   0xc   :  { %18 = vsyncpa [#allocation4 + $0x1], 0 }
   0xd   :  { %19 = vsyncpa [#allocation7], 0 }
   0xe   :  { %21 = vsyncpa [#allocation7 + $0x1], 0 }
   0xf   :  { %22 = vsyncpa [#allocation10], 0 }
  0x10   :  { %23 = vsyncpa [#allocation13], 0 }
  0x11   :  { %24 = vsyncpa [#allocation5], 0 }
  0x12   :  { %26 = vsyncpa [#allocation5 + $0x1], 0  ;;  %s2254_s17 = smov 0   ;;  %s2256_s18 = smov 0  }
  0x13   :  { %s2258_s19 = smov 0   ;;  %s2260_s20 = smov 0  }
  0x14   :  { %s2262_s21 = smov 0   ;;  %s2264_s22 = smov 0  }
  0x15   :  { %s2266_s23 = smov 0   ;;  %s2268_s24 = smov 0  }
  0x16   :  { %s2270_s25 = smov 0   ;;  %s2272_s26 = smov 0  }
  0x17   :  { %s2274_s27 = smov 0  }
  0x18 LB: > { %2821 = sst [smem:[#allocation21_spill]] %s2161_s23  ;;  %s2308_s28 = sadd.s32 4294967295, %s2177_s27   ;;  %s2177_s27 = sphi %s2274_s27, %s32_s27   ;;  %s2173_s26 = sphi %s2272_s26, %s2871_s26   ;;  %s2169_s25 = sphi %s2270_s25, %s2870_s25   ;;  %s2165_s24 = sphi %s2268_s24, %s2869_s24   ;;  %s2161_s23 = sphi %s2266_s23, %s2868_s23   ;;  %s2157_s22 = sphi %s2264_s22, %s2867_s22   ;;  %s2153_s21 = sphi %s2262_s21, %s2866_s21   ;;  %s2149_s20 = sphi %s2260_s20, %s2865_s20   ;;  %s2145_s19 = sphi %s2258_s19, %s2864_s19   ;;  %s2141_s18 = sphi %s2256_s18, %s2863_s18   ;;  %s2137_s17 = sphi %s2254_s17, %s2862_s17  }
  0x19   : > { %2822 = sst [smem:[#allocation22_spill]] %s2165_s24  ;;  %p66_p0 = scmp.ne.s32.totalorder %s2153_s21, %s2149_s20 }
  0x1a   : > { %p2803_p1 = scmp.eq.s32.totalorder %s2308_s28, 0  ;;  %p1487_p2 = scmp.ge.s32.totalorder %s2177_s27, 1 }
  0x1b   : > { %p318_p3 = scmp.lt.s32.totalorder %s2177_s27, 5  ;;  %s2179_s12 = smov [#allocation8]  }
  0x1c   : > { %p2316_p4 = por %p2803_p1, %p66_p0  ;;  %s330_s13 = sshll.u32 %s2179_s12, 4  ;;  %s2324_s13 = int_to_ptr.vmem [resolvable:$true] %s330_s13 }
  0x1d   : > { %p2320_p5 = pnand %p1487_p2, %p318_p3  ;;  %s2180_s15 = smov [#allocation9]  }
  0x1e   : > { %s2823_s29 = scalar_select %p2316_p4, 1, 0 }
  0x1f   : > { %s2825_s30 = scalar_select %p2320_p5, 1, 0 }
  0x20   : > { %2824 = sst [smem:[#allocation23_spill]] %s2823_s29  ;;  %p1701_p6 = pneg %p2320_p5 }
  0x21   : > { %2826 = sst [smem:[#allocation24_spill]] %s2825_s30  ;;  %s346_s16 = sshll.u32 %s2180_s15, 4  ;;  %s2334_s16 = int_to_ptr.vmem [resolvable:$true] %s346_s16 }
  0x22   : > { %p2330_p7 = pnand %p1701_p6, %p2803_p1  ;;  %s2181_s20 = smov [#allocation11]  }
  0x23   : > { %s2336_s11 = sshll.u32 %s2181_s20, 4  ;;  %s2828_s2 = sld [smem:[#allocation26_spill]]  ;;  %s369_s11 = int_to_ptr.vmem [resolvable:$true] %s2336_s11 }
  0x24   : > { %p2346_p9 = pneg %p2330_p7 }
  0x29   : > { %s1867_s12 = scalar_lea.hbm %s2828_s2, 128 }
  0x2a   : > { %p1868_p8 = scmp.ne.s32.totalorder %s2828_s2, %s1867_s12  ;;  %p1874_p12 = scmp.lt.u32.totalorder %s1867_s12, %s2828_s2 }
  0x2c   : > { %p1870_p10 = pnand %p2346_p9, %p1868_p8 }
  0x2e   : > { %p1871_p11 = pneg %p1870_p10 }
  0x30   : > { %p1876_p13 = pnand %p1874_p12, %p1871_p11 }
  0x32   : > { %1879 = shalt.err (!%p1876_p13)
}
  0x33   : > { %s1880_s5 = scalar_lea.vmem %s2324_s13, 128  ;;  %p1888_p6 = scmp.lt.s32.totalorder %s2324_s13, %s2324_s13 }
  0x34   : > { %p1881_p0 = scmp.ne.s32.totalorder %s2324_s13, %s1880_s5  ;;  %p1889_p1 = scmp.lt.s32.totalorder %s1880_s5, %s1880_s5 }
  0x36   : > { %p1883_p2 = pnand %p1881_p0, %p2346_p9  ;;  %p1890_p8 = por %p1889_p1, %p1888_p6 }
  0x38   : > { %p1884_p3 = pneg %p1883_p2 }
  0x3a   : > { %p1891_p10 = pnand %p1890_p8, %p1884_p3 }
  0x3c   : > { %1894 = shalt.err (!%p1891_p10)
}
  0x3d   : > { %s2182_s7 = smov 64   ;;  %s2183_s10 = smov 4  }
  0x3e   : > { %1704 = dma.hbm_to_vmem [thread:$0]  (!%p2330_p7), %s2828_s2, 128, %s2324_s13, [#allocation7], %s2182_s7, %s2182_s7, %s2183_s10  }
  0x3f   : > { %s2830_s4 = sld [smem:[#allocation28_spill]] }
  0x45   : > { %s1895_s5 = scalar_lea.hbm %s2830_s4, 1024 }
  0x46   : > { %p1896_p1 = scmp.ne.s32.totalorder %s2830_s4, %s1895_s5  ;;  %p1902_p13 = scmp.lt.u32.totalorder %s1895_s5, %s2830_s4 }
  0x48   : > { %p1898_p11 = pnand %p1896_p1, %p2346_p9 }
  0x4a   : > { %p1899_p12 = pneg %p1898_p11 }
  0x4c   : > { %p1904_p0 = pnand %p1902_p13, %p1899_p12 }
  0x4e   : > { %1907 = shalt.err (!%p1904_p0)
}
  0x4f   : > { %s1908_s13 = scalar_lea.vmem %s2334_s16, 1024  ;;  %p1916_p8 = scmp.lt.s32.totalorder %s2334_s16, %s2334_s16 }
  0x50   : > { %p1909_p2 = scmp.ne.s32.totalorder %s2334_s16, %s1908_s13  ;;  %p1917_p10 = scmp.lt.s32.totalorder %s1908_s13, %s1908_s13 }
  0x52   : > { %p1911_p3 = pnand %p1909_p2, %p2346_p9  ;;  %p1918_p1 = por %p1917_p10, %p1916_p8 }
  0x54   : > { %p1912_p6 = pneg %p1911_p3 }
  0x56   : > { %p1919_p11 = pnand %p1918_p1, %p1912_p6 }
  0x58   : > { %1922 = shalt.err (!%p1919_p11)
}
  0x59   : > { %1707 = dma.hbm_to_vmem [thread:$0]  (!%p2330_p7), %s2830_s4, 1024, %s2334_s16, [#allocation10], %s2182_s7, %s2182_s7, %s2183_s10  }
  0x5a   : > { %s2831_s8 = sld [smem:[#allocation32_spill]] }
  0x60   : > { %s1923_s24 = scalar_lea.hbm %s2831_s8, 1024 }
  0x61   : > { %p1924_p12 = scmp.ne.s32.totalorder %s2831_s8, %s1923_s24  ;;  %p1930_p2 = scmp.lt.u32.totalorder %s1923_s24, %s2831_s8 }
  0x63   : > { %p1926_p13 = pnand %p1924_p12, %p2346_p9 }
  0x65   : > { %p1927_p0 = pneg %p1926_p13 }
  0x67   : > { %p1932_p3 = pnand %p1930_p2, %p1927_p0 }
  0x69   : > { %1935 = shalt.err (!%p1932_p3)
}
  0x6a   : > { %s1936_s13 = scalar_lea.vmem %s369_s11, 1024  ;;  %p1944_p1 = scmp.lt.s32.totalorder %s369_s11, %s369_s11 }
  0x6b   : > { %p1937_p6 = scmp.ne.s32.totalorder %s369_s11, %s1936_s13  ;;  %p1945_p11 = scmp.lt.s32.totalorder %s1936_s13, %s1936_s13 }
  0x6d   : > { %p1939_p8 = pnand %p1937_p6, %p2346_p9  ;;  %p1946_p4 = por %p1945_p11, %p1944_p1 }
  0x6f   : > { %p1940_p10 = pneg %p1939_p8 }
  0x71   : > { %p1947_p5 = pnand %p1946_p4, %p1940_p10 }
  0x73   : > { %1950 = shalt.err (!%p1947_p5)
}
  0x74   : > { %1710 = dma.hbm_to_vmem [thread:$0]  (!%p2330_p7), %s2831_s8, 1024, %s369_s11, [#allocation10], %s2182_s7, %s2182_s7, %s2183_s10  }
  0x75   : > { %s2184_s23 = smov [#allocation12]   ;;  %s1951_s12 = scalar_lea.hbm %s2799_s9, 1024 }
  0x76   : > { %s381_s29 = sshll.u32 %s2184_s23, 4  ;;  %p1952_p4 = scmp.ne.s32.totalorder %s2799_s9, %s1951_s12  ;;  %s382_s29 = int_to_ptr.vmem [resolvable:$true] %s381_s29 }
  0x77   : > { %p1958_p13 = scmp.lt.u32.totalorder %s1951_s12, %s2799_s9 }
  0x78   : > { %p1954_p5 = pnand %p1952_p4, %p2346_p9 }
  0x7a   : > { %p1955_p12 = pneg %p1954_p5 }
  0x7c   : > { %p1960_p0 = pnand %p1958_p13, %p1955_p12 }
  0x7e   : > { %1963 = shalt.err (!%p1960_p0)
}
  0x7f   : > { %s1964_s11 = scalar_lea.vmem %s382_s29, 1024  ;;  %p1972_p8 = scmp.lt.s32.totalorder %s382_s29, %s382_s29 }
  0x80   : > { %p1965_p2 = scmp.ne.s32.totalorder %s382_s29, %s1964_s11  ;;  %p1973_p10 = scmp.lt.s32.totalorder %s1964_s11, %s1964_s11 }
  0x82   : > { %p1967_p3 = pnand %p1965_p2, %p2346_p9  ;;  %p1974_p1 = por %p1973_p10, %p1972_p8 }
  0x84   : > { %p1968_p6 = pneg %p1967_p3 }
  0x86   : > { %p1975_p11 = pnand %p1974_p1, %p1968_p6 }
  0x88   : > { %1978 = shalt.err (!%p1975_p11)
}
  0x89   : > { %1713 = dma.hbm_to_vmem [thread:$0]  (!%p2330_p7), %s2799_s9, 1024, %s382_s29, [#allocation13], %s2182_s7, %s2182_s7, %s2183_s10  }
  0x8a   : > { %s41_s3 = sadd.s32 1, %s2169_s25  ;;  %s44_s14 = sadd.s32 1, %s2173_s26 }
  0x8b   : > { %p42_p9 = scmp.ge.s32.totalorder %s41_s3, 2  ;;  %s53_s23 = sadd.s32 1, %s2157_s22 }
  0x8c   : > { %p60_p4 = scmp.ne.s32.totalorder %s2157_s22, %s2153_s21  ;;  %p61_p5 = scmp.eq.s32.totalorder %s2177_s27, 0 }
  0x8d   : > { %s2873_s3 = smov (%p42_p9, %s41_s3), 0  ;;  %s2875_s14 = smov (!%p42_p9, %s44_s14), %s2173_s26 }
  0x8e   : > { %s49_s30 = ssub.s32 %s2169_s25, %s2873_s3  ;;  %p2452_p12 = por %p61_p5, %p60_p4 }
  0x8f   : > { %p46_p7 = scmp.ge.s32.totalorder %s2875_s14, 2  ;;  %p2809_p13 = scmp.lt.s32.totalorder %s2177_s27, 4 }
  0x90   : > { %s398_s7 = sand.u32 1, %s2157_s22   ;;  %s1495_s10 = sshll.u32 %s2169_s25, 2 }
  0x91   : > { %s2877_s14 = smov (%p46_p7, %s2875_s14), 0  ;;  %s1493_s29 = sshll.u32 %s398_s7, 8 }
  0x92   : > { %s2463_s12 = ssub.s32 %s2173_s26, %s2877_s14  ;;  %s1546_s20 = sshll.u32 %s2173_s26, 7 }
  0x93   : > { %s50_s15 = sor.u32 %s49_s30, %s2463_s12  ;;  %s409_s5 = sadd.s32 %s1546_s20, %s1495_s10 }
  0x94   : > { %p51_p0 = scmp.eq.s32.totalorder %s50_s15, 0  ;;  %s1497_s13 = sshll.u32 %s409_s5, 6 }
  0x95   : > { %s402_s11 = scalar_lea.vmem [#allocation3], %s1493_s29  ;;  %s2833_s0 = sld [smem:[#allocation25_spill]] }
  0x96   : > { %s412_s16 = sshll.u32 %s402_s11, 4  ;;  %p2483_p2 = pnand %p2809_p13, %p2452_p12  ;;  %s2477_s16 = int_to_ptr.vmem [resolvable:$true] %s412_s16 }
  0x97   : > { %s2470_s6 = scalar_select %p51_p0, %s2157_s22, %s53_s23  }
  0x98   : > { %s2487_s23 = scalar_lea.sflag [#allocation4], %s398_s7  ;;  %p1981_p6 = pneg %p2483_p2 }
  0x9b   : > { %s2475_s8 = scalar_lea.hbm %s2833_s0, %s1497_s13  ;;  %s1984_s24 = scalar_lea.hbm %s2833_s0, 16384 }
  0x9c   : > { %s1979_s10 = scalar_lea.hbm %s2475_s8, 4096  ;;  %p1985_p1 = scmp.lt.u32.totalorder %s2475_s8, %s2833_s0 }
  0x9d   : > { %p1980_p3 = scmp.ne.s32.totalorder %s2475_s8, %s1979_s10  ;;  %p1986_p11 = scmp.lt.u32.totalorder %s1984_s24, %s1979_s10 }
  0x9e   : > { %p1988_p4 = scmp.lt.u32.totalorder %s1979_s10, %s2475_s8 }
  0x9f   : > { %p1982_p8 = pnand %p1981_p6, %p1980_p3  ;;  %p1987_p9 = por %p1986_p11, %p1985_p1 }
  0xa1   : > { %p1983_p10 = pneg %p1982_p8  ;;  %p1989_p12 = por %p1988_p4, %p1987_p9 }
  0xa3   : > { %p1990_p7 = pnand %p1989_p12, %p1983_p10 }
  0xa5   : > { %1993 = shalt.err (!%p1990_p7)
}
  0xa6   : > { %s1994_s7 = scalar_lea.vmem %s2477_s16, 4096  ;;  %s2185_s5 = smov [#allocation3]  }
  0xa7   : > { %p1995_p0 = scmp.ne.s32.totalorder %s2477_s16, %s1994_s7  ;;  %s1999_s13 = sshll.u32 %s2185_s5, 4  ;;  %s2000_s13 = int_to_ptr.vmem [resolvable:$false] %s1999_s13 }
  0xa8   : > { %s2001_s11 = scalar_lea.vmem %s2000_s13, 8192  ;;  %p2002_p13 = scmp.lt.s32.totalorder %s2477_s16, %s2000_s13 }
  0xa9   : > { %p1997_p3 = pnand %p1995_p0, %p1981_p6  ;;  %p2003_p1 = scmp.lt.s32.totalorder %s2001_s11, %s1994_s7 }
  0xab   : > { %p1998_p8 = pneg %p1997_p3  ;;  %p2004_p11 = por %p2003_p1, %p2002_p13 }
  0xad   : > { %p2005_p9 = pnand %p2004_p11, %p1998_p8 }
  0xaf   : > { %2008 = shalt.err (!%p2005_p9)
}
  0xb0   : > { %s2186_s10 = smov 512   ;;  %s2187_s2 = smov 256  }
  0xb1   : > { %s2188_s4 = smov 16   ;;  %s1486_s24 = sadd.s32 4294967294, %s2177_s27  }
  0xb2   : > { %1717 = dma.hbm_to_vmem [thread:$0]  (!%p2483_p2), %s2475_s8, 4096, %s2477_s16, %s2487_s23, %s2186_s10, %s2187_s2, %s2188_s4  }
  0xb3   : > { %p77_p13 = scmp.eq.s32.totalorder %s2463_s12, 0  ;;  %s79_s29 = sadd.s32 1, %s2145_s19 }
  0xb4   : > { %p86_p6 = scmp.ne.s32.totalorder %s2145_s19, %s2141_s18  ;;  %p92_p10 = scmp.ne.s32.totalorder %s2141_s18, %s2137_s17 }
  0xb5   : > { %s2523_s15 = scalar_select %p77_p13, %s2145_s19, %s79_s29  }
  0xb6   : > { %p88_p4 = por %p86_p6, %p61_p5  ;;  %p2835_p12 = scmp.eq.s32.totalorder %s2308_s28, 0 }
  0xb7   : > { %p305_p0 = scmp.eq.s32.totalorder %s2308_s28, 3  ;;  %p311_p3 = scmp.eq.s32.totalorder %s1486_s24, 3 }
  0xb8   : > { %p2529_p7 = por %p92_p10, %p2835_p12  ;;  %s422_s30 = sand.u32 1, %s2177_s27  }
  0xb9   : > { %s424_s8 = sand.u32 1, %s2145_s19   ;;  %p2536_p2 = por %p305_p0, %p86_p6 }
  0xba   : > { %p2540_p8 = por %p311_p3, %p92_p10  ;;  %s1498_s23 = sshll.u32 %s424_s8, 3 }
  0xbb   : > { %s2837_s16 = scalar_select %p2536_p2, 1, 0 }
  0xbc   : > { %s2838_s12 = scalar_select %p2540_p8, 1, 0 }
  0xbd   : > { %s2549_s11 = scalar_lea.hbm %s2791_s1, %s1546_s20  ;;  %s426_s10 = scalar_lea.vmem [#allocation6], %s1498_s23 }
  0xbe   : > { %s433_s2 = sshll.u32 %s426_s10, 4  ;;  %p2839_p5 = scmp.lt.s32.totalorder %s2177_s27, 4  ;;  %s2557_s2 = int_to_ptr.vmem [resolvable:$true] %s433_s2 }
  0xbf   : > { %s423_s24 = scalar_lea.sflag [#allocation7], %s422_s30  ;;  %s2009_s29 = scalar_lea.hbm %s2549_s11, 128 }
  0xc0   : > { %p2553_p1 = pnand %p2839_p5, %p88_p4  ;;  %p2010_p11 = scmp.ne.s32.totalorder %s2549_s11, %s2009_s29 }
  0xc1   : > { %s2014_s23 = scalar_lea.hbm %s2791_s1, 256  ;;  %p2015_p10 = scmp.lt.u32.totalorder %s2549_s11, %s2791_s1 }
  0xc2   : > { %p2011_p9 = pneg %p2553_p1  ;;  %p2016_p4 = scmp.lt.u32.totalorder %s2014_s23, %s2009_s29 }
  0xc3   : > { %p2018_p0 = scmp.lt.u32.totalorder %s2009_s29, %s2549_s11 }
  0xc4   : > { %p2012_p13 = pnand %p2011_p9, %p2010_p11  ;;  %p2017_p12 = por %p2016_p4, %p2015_p10 }
  0xc6   : > { %p2013_p6 = pneg %p2012_p13  ;;  %p2019_p3 = por %p2018_p0, %p2017_p12 }
  0xc8   : > { %p2020_p5 = pnand %p2019_p3, %p2013_p6 }
  0xca   : > { %2023 = shalt.err (!%p2020_p5)
}
  0xcb   : > { %s2024_s30 = scalar_lea.vmem %s2557_s2, 128  ;;  %s2189_s10 = smov [#allocation6]  }
  0xcc   : > { %p2025_p11 = scmp.ne.s32.totalorder %s2557_s2, %s2024_s30  ;;  %s2029_s20 = sshll.u32 %s2189_s10, 4  ;;  %s2030_s20 = int_to_ptr.vmem [resolvable:$false] %s2029_s20 }
  0xcd   : > { %s2031_s8 = scalar_lea.vmem %s2030_s20, 256  ;;  %p2032_p2 = scmp.lt.s32.totalorder %s2557_s2, %s2030_s20 }
  0xce   : > { %p2027_p13 = pnand %p2025_p11, %p2011_p9  ;;  %p2033_p10 = scmp.lt.s32.totalorder %s2031_s8, %s2024_s30 }
  0xd0   : > { %p2028_p8 = pneg %p2027_p13  ;;  %p2034_p4 = por %p2033_p10, %p2032_p2 }
  0xd2   : > { %p2035_p12 = pnand %p2034_p4, %p2028_p8 }
  0xd4   : > { %2038 = shalt.err (!%p2035_p12)
}
  0xd5   : > { %1720 = dma.hbm_to_vmem [thread:$0]  (!%p2553_p1), %s2549_s11, 128, %s2557_s2, %s423_s24  }
  0xd6   : > { %s2841_s29 = sld [smem:[#allocation24_spill]] }
  0xdc   : > { %p2842_p6 = scmp.ne.s32.totalorder %s2841_s29, 0 }
  0xdd   : > { %s2843_s23 = sld [smem:[#allocation23_spill]] (!%p2842_p6)  ;;  %s444_s5 = sand.u32 (!%p2842_p6), 1, %s2153_s21  }
  0xde   : > { %442 = sbr.rel (%p2842_p6) target bundleno = 1523 (0x5f3), region = 64  ;;  %s1501_s13 = sshll.u32 (!%p2842_p6), %s444_s5, 8 }
  0xdf   : > { %s445_s10 = scalar_lea.sflag (!%p2842_p6), [#allocation4], %s444_s5  ;;  %s2587_s0 = scalar_lea.vmem (!%p2842_p6), [#allocation3], %s1501_s13 }
  0xe3   : > { %p2844_p9 = scmp.ne.s32.totalorder (!%p2842_p6), %s2843_s23, 0 }
  0xe5   : > { %2112 = dma.done.wait (%p2844_p9), %s445_s10, 4096  }
  0xe6   : > { %2114 = vsyncadd (%p2844_p9), %s445_s10, 4294963200  ;;  %s453_s11 = sand.u32 1, %s2308_s28   ;;  %s455_s2 = sand.u32 1, %s2141_s18  }
  0xe7   : > { %s2597_s4 = sshll.u32 %s455_s2, 3  ;;  %s454_s24 = scalar_lea.sflag [#allocation7], %s453_s11 }
  0xe8   : > { %s457_s30 = scalar_lea.vmem [#allocation6], %s2597_s4 }
  0xe9   : > { %2116 = dma.done.wait (%p2529_p7), %s454_s24, 128  }
  0xea   : > { %2118 = vsyncadd (%p2529_p7), %s454_s24, 4294967168  ;;  %p2845_p2 = scmp.eq.s32.totalorder %s2308_s28, 0 }
  0xec   : > { %2120 = dma.done.wait (%p2845_p2), [#allocation7], 128   ;;  %p2846_p8 = pmov %p2845_p2 }
  0xed   : > { %p2847_p1 = pmov %p2845_p2 }
  0xee   : > { %2122 = vsyncadd (%p2846_p8), [#allocation7], 4294967168 }
  0xef   : > { %2124 = dma.done.wait (%p2847_p1), [#allocation10], 2048   ;;  %p2848_p0 = pmov %p2847_p1 }
  0xf1   : > { %2126 = vsyncadd (%p2848_p0), [#allocation10], 4294965248  ;;  %p2849_p3 = pmov %p2848_p0 }
  0xf2   : > { %p2850_p5 = pmov %p2848_p0 }
  0xf3   : > { %2128 = dma.done.wait (%p2849_p3), [#allocation13], 1024  }
  0xf4   : > { %2130 = vsyncadd (%p2850_p5), [#allocation13], 4294966272  ;;  %s516_s7 = scalar_lea.vmem [#allocation14], %s2597_s4  ;;  %s2851_s20 = sld [smem:[#allocation21_spill]] }
  0xfa   : > { %p1508_p7 = scmp.ne.s32.totalorder %s2851_s20, 0 }
  0xfb   : > { %vm524_vm0 = vcmask (!%p1508_p7), 130048   ;;  %v2190_v0 = vmov (!%p1508_p7), 0.0  }
  0xfc   : > { %523 = sbr.rel (%p1508_p7) target bundleno = 259 (0x103), region = 92  ;;  %525 = vst.msk [vmem:[#allocation2] sm:$0xff] (!%p1508_p7), %vm524_vm0, %v2190_v0 }
 0x103 PF: > { %v530_v1 = vld [vmem:[%s2587_s0 + $0x20] sm:$0xff]  ;;  %v531_v2 = vld [vmem:[%s2587_s0 + $0x28] sm:$0xff]  ;;  %v532_v9 = vld [vmem:[%s2587_s0 + $0x30] sm:$0xff]  ;;  %vm730_vm1 = vcmask 130112   ;;  %vm795_vm2 = vcmask 1041409   ;;  %vm797_vm3 = vcmask 1042434  }
 0x104   : > { %v526_v3 = vld [vmem:[%s2587_s0] sm:$0xff]  ;;  %v566_v4 = vunpack.c.l.bf16 %v530_v1  ;;  %v567_v5 = vunpack.c.h.bf16 %v530_v1  ;;  %v568_v6 = vunpack.c.l.bf16 %v531_v2  ;;  %v569_v7 = vunpack.c.h.bf16 %v531_v2  ;;  %v527_v8 = vld [vmem:[%s2587_s0 + $0x8] sm:$0xff]  ;;  %v533_v10 = vld [vmem:[%s2587_s0 + $0x38] sm:$0xff] }
 0x105   : > { %v558_v11 = vunpack.c.l.bf16 %v526_v3  ;;  %v559_v12 = vunpack.c.h.bf16 %v526_v3  ;;  %v560_v13 = vunpack.c.l.bf16 %v527_v8  ;;  %v561_v14 = vunpack.c.h.bf16 %v527_v8  ;;  %v528_v15 = vld [vmem:[%s2587_s0 + $0x10] sm:$0xff]  ;;  %v529_v16 = vld [vmem:[%s2587_s0 + $0x18] sm:$0xff]  ;;  %v534_v31 = vld [vmem:[%s2587_s0 + $0x40] sm:$0xff] }
 0x106   : > { %v633_v17 = vadd.f32 %v567_v5, %v566_v4  ;;  %v570_v18 = vunpack.c.l.bf16 %v532_v9  ;;  %v571_v19 = vunpack.c.h.bf16 %v532_v9  ;;  %v572_v20 = vunpack.c.l.bf16 %v533_v10  ;;  %v536_v21 = vld [vmem:[%s2587_s0 + $0x50] sm:$0xff]  ;;  %v537_v26 = vld [vmem:[%s2587_s0 + $0x58] sm:$0xff]  ;;  %v535_v36 = vld [vmem:[%s2587_s0 + $0x48] sm:$0xff] }
 0x107   : > { %v623_v22 = vadd.f32 %v559_v12, %v558_v11  ;;  %v573_v23 = vunpack.c.h.bf16 %v533_v10  ;;  %v562_v24 = vunpack.c.l.bf16 %v528_v15  ;;  %v563_v25 = vunpack.c.h.bf16 %v528_v15  ;;  %v540_v40 = vld [vmem:[%s2587_s0 + $0x70] sm:$0xff]  ;;  %v541_v45 = vld [vmem:[%s2587_s0 + $0x78] sm:$0xff]  ;;  %v538_v46 = vld [vmem:[%s2587_s0 + $0x60] sm:$0xff] }
 0x108   : > { %v634_v27 = vadd.f32 %v633_v17, %v568_v6  ;;  %v638_v28 = vadd.f32 %v571_v19, %v570_v18  ;;  %v564_v29 = vunpack.c.l.bf16 %v529_v16  ;;  %v565_v30 = vunpack.c.h.bf16 %v529_v16  ;;  %v539_v51 = vld [vmem:[%s2587_s0 + $0x68] sm:$0xff]  ;;  %v544_v56 = vld [vmem:[%s2587_s0 + $0x90] sm:$0xff]  ;;  %v545_v61 = vld [vmem:[%s2587_s0 + $0x98] sm:$0xff] }
 0x109   : > { %v624_v32 = vadd.f32 %v623_v22, %v560_v13  ;;  %v628_v33 = vadd.f32 %v563_v25, %v562_v24  ;;  %v578_v34 = vunpack.c.l.bf16 %v536_v21  ;;  %v579_v35 = vunpack.c.h.bf16 %v536_v21  ;;  %v542_v2 = vld [vmem:[%s2587_s0 + $0x80] sm:$0xff]  ;;  %v548_v12 = vld [vmem:[%s2587_s0 + $0xb0] sm:$0xff]  ;;  %v549_v17 = vld [vmem:[%s2587_s0 + $0xb8] sm:$0xff] }
 0x10a   : > { %v635_v37 = vadd.f32 %v634_v27, %v569_v7  ;;  %v639_v38 = vadd.f32 %v638_v28, %v572_v20  ;;  %v580_v39 = vunpack.c.l.bf16 %v537_v26  ;;  %v574_v44 = vunpack.c.l.bf16 %v534_v31  ;;  %v543_v7 = vld [vmem:[%s2587_s0 + $0x88] sm:$0xff]  ;;  %v546_v18 = vld [vmem:[%s2587_s0 + $0xa0] sm:$0xff]  ;;  %v552_v28 = vld [vmem:[%s2587_s0 + $0xd0] sm:$0xff] }
 0x10b   : > { %v625_v41 = vadd.f32 %v624_v32, %v561_v14  ;;  %v629_v42 = vadd.f32 %v628_v33, %v564_v29  ;;  %v648_v43 = vadd.f32 %v579_v35, %v578_v34  ;;  %v581_v48 = vunpack.c.h.bf16 %v537_v26  ;;  %v547_v27 = vld [vmem:[%s2587_s0 + $0xa8] sm:$0xff]  ;;  %v553_v33 = vld [vmem:[%s2587_s0 + $0xd8] sm:$0xff] }
 0x10c   : > { %636 = vadd.xlane.f32.xlu1 %v635_v37  ;;  %v640_v47 = vadd.f32 %v639_v38, %v573_v23  ;;  %v575_v49 = vunpack.c.h.bf16 %v534_v31  ;;  %v576_v50 = vunpack.c.l.bf16 %v535_v36  ;;  %v586_v54 = vunpack.c.l.bf16 %v540_v40  ;;  %v550_v38 = vld [vmem:[%s2587_s0 + $0xc0] sm:$0xff] }
 0x10d   : > { %626 = vadd.xlane.f32.xlu0 %v625_v41  ;;  %v630_v52 = vadd.f32 %v629_v42, %v565_v30  ;;  %v649_v53 = vadd.f32 %v648_v43, %v580_v39  ;;  %v587_v55 = vunpack.c.h.bf16 %v540_v40  ;;  %v577_v57 = vunpack.c.h.bf16 %v535_v36  ;;  %v551_v43 = vld [vmem:[%s2587_s0 + $0xc8] sm:$0xff] }
 0x10e   : > { %v643_v58 = vadd.f32 %v575_v49, %v574_v44  ;;  %v588_v59 = vunpack.c.l.bf16 %v541_v45  ;;  %v582_v60 = vunpack.c.l.bf16 %v538_v46  ;;  %v589_v62 = vunpack.c.h.bf16 %v541_v45 }
 0x10f   : > { %v658_v63 = vadd.f32 %v587_v55, %v586_v54  ;;  %v583_v0 = vunpack.c.h.bf16 %v538_v46  ;;  %v584_v1 = vunpack.c.l.bf16 %v539_v51  ;;  %v650_v3 = vadd.f32 %v649_v53, %v581_v48  ;;  %v556_v48 = vld [vmem:[%s2587_s0 + $0xf0] sm:$0xff]  ;;  %v557_v53 = vld [vmem:[%s2587_s0 + $0xf8] sm:$0xff]  ;;  %v554_v54 = vld [vmem:[%s2587_s0 + $0xe0] sm:$0xff] }
 0x110   : > { %641 = vadd.xlane.f32.xlu1 %v640_v47  ;;  %v644_v4 = vadd.f32 %v643_v58, %v576_v50  ;;  %v594_v5 = vunpack.c.l.bf16 %v544_v56  ;;  %v595_v6 = vunpack.c.h.bf16 %v544_v56  ;;  %v585_v9 = vunpack.c.h.bf16 %v539_v51 }
 0x111   : > { %631 = vadd.xlane.f32.xlu0 %v630_v52  ;;  %v659_v8 = vadd.f32 %v658_v63, %v588_v59  ;;  %v653_v10 = vadd.f32 %v583_v0, %v582_v60  ;;  %v596_v11 = vunpack.c.l.bf16 %v545_v61  ;;  %v590_v15 = vunpack.c.l.bf16 %v542_v2 }
 0x112   : > { %v645_v13 = vadd.f32 %v644_v4, %v577_v57  ;;  %v668_v14 = vadd.f32 %v595_v6, %v594_v5  ;;  %v591_v16 = vunpack.c.h.bf16 %v542_v2  ;;  %v597_v21 = vunpack.c.h.bf16 %v545_v61 }
 0x113   : > { %v660_v19 = vadd.f32 %v659_v8, %v589_v62  ;;  %v654_v20 = vadd.f32 %v653_v10, %v584_v1  ;;  %v592_v22 = vunpack.c.l.bf16 %v543_v7  ;;  %v602_v25 = vunpack.c.l.bf16 %v548_v12  ;;  %v555_v62 = vld [vmem:[%s2587_s0 + $0xe8] sm:$0xff]  ;;  %s2852_s0 = sld [smem:[#allocation21_spill]] }
 0x114   : > { %651 = vadd.xlane.f32.xlu1 %v650_v3  ;;  %v669_v23 = vadd.f32 %v668_v14, %v596_v11  ;;  %v663_v24 = vadd.f32 %v591_v16, %v590_v15  ;;  %v603_v26 = vunpack.c.h.bf16 %v548_v12  ;;  %v593_v30 = vunpack.c.h.bf16 %v543_v7 }
 0x115   : > { %646 = vadd.xlane.f32.xlu0 %v645_v13  ;;  %v655_v29 = vadd.f32 %v654_v20, %v585_v9  ;;  %v604_v31 = vunpack.c.l.bf16 %v549_v17  ;;  %v598_v32 = vunpack.c.l.bf16 %v546_v18  ;;  %v605_v35 = vunpack.c.h.bf16 %v549_v17 }
 0x116   : > { %v664_v34 = vadd.f32 %v663_v24, %v592_v22  ;;  %v678_v36 = vadd.f32 %v603_v26, %v602_v25  ;;  %v599_v37 = vunpack.c.h.bf16 %v546_v18  ;;  %v670_v39 = vadd.f32 %v669_v23, %v597_v21 }
 0x117   : > { %v600_v40 = vunpack.c.l.bf16 %v547_v27  ;;  %v610_v41 = vunpack.c.l.bf16 %v552_v28  ;;  %v611_v42 = vunpack.c.h.bf16 %v552_v28  ;;  %v601_v45 = vunpack.c.h.bf16 %v547_v27 }
 0x118   : > { %661 = vadd.xlane.f32.xlu1 %v660_v19  ;;  %v679_v44 = vadd.f32 %v678_v36, %v604_v31  ;;  %v673_v46 = vadd.f32 %v599_v37, %v598_v32  ;;  %v612_v47 = vunpack.c.l.bf16 %v553_v33  ;;  %v665_v49 = vadd.f32 %v664_v34, %v593_v30 }
 0x119   : > { %656 = vadd.xlane.f32.xlu0 %v655_v29  ;;  %v688_v50 = vadd.f32 %v611_v42, %v610_v41  ;;  %v606_v51 = vunpack.c.l.bf16 %v550_v38  ;;  %v607_v52 = vunpack.c.h.bf16 %v550_v38  ;;  %v613_v56 = vunpack.c.h.bf16 %v553_v33  ;;  %p1509_p11 = scmp.ne.s32.totalorder %s2852_s0, 1 }
 0x11a   : > { %v674_v55 = vadd.f32 %v673_v46, %v600_v40  ;;  %v608_v57 = vunpack.c.l.bf16 %v551_v43  ;;  %v680_v58 = vadd.f32 %v679_v44, %v605_v35  ;;  %v618_v60 = vunpack.c.l.bf16 %v556_v48  ;;  %s2853_s29 = sld [smem:[#allocation30_spill]] (!%p1509_p11)  ;;  %s2854_s13 = sld [smem:[#allocation27_spill]] (!%p1509_p11) }
 0x11b   : > { %v683_v59 = vadd.f32 %v607_v52, %v606_v51  ;;  %v619_v61 = vunpack.c.h.bf16 %v556_v48  ;;  %v689_v63 = vadd.f32 %v688_v50, %v612_v47  ;;  %v609_v0 = vunpack.c.h.bf16 %v551_v43  ;;  %s2855_s24 = sld [smem:[#allocation31_spill]] (!%p1509_p11)  ;;  %s2856_s0 = sld [smem:[#allocation29_spill]] (!%p1509_p11) }
 0x11c   : > { %671 = vadd.xlane.f32.xlu1 %v670_v39  ;;  %v620_v1 = vunpack.c.l.bf16 %v557_v53  ;;  %v614_v2 = vunpack.c.l.bf16 %v554_v54  ;;  %v675_v3 = vadd.f32 %v674_v55, %v601_v45  ;;  %v615_v6 = vunpack.c.h.bf16 %v554_v54 }
 0x11d   : > { %666 = vadd.xlane.f32.xlu0 %v665_v49  ;;  %v684_v4 = vadd.f32 %v683_v59, %v608_v57  ;;  %v698_v5 = vadd.f32 %v619_v61, %v618_v60  ;;  %v616_v7 = vunpack.c.l.bf16 %v555_v62  ;;  %v690_v9 = vadd.f32 %v689_v63, %v613_v56 }
 0x11e   : > { %v693_v8 = vadd.f32 %v615_v6, %v614_v2  ;;  %v621_v10 = vunpack.c.h.bf16 %v557_v53  ;;  %v617_v13 = vunpack.c.h.bf16 %v555_v62  ;;  %v719_v21 = vlaneseq }
 0x11f   : > { %v699_v11 = vadd.f32 %v698_v5, %v620_v1  ;;  %v685_v12 = vadd.f32 %v684_v4, %v609_v0  ;;  %vm799_vm4 = vcmask 1043459   ;;  %vm801_vm5 = vcmask 1044484  }
 0x120   : > { %681 = vadd.xlane.f32.xlu1 %v680_v58  ;;  %v694_v14 = vadd.f32 %v693_v8, %v616_v7  ;;  %v720_v24 = vand.u32 127, %v719_v21  ;;  %v722_v28 = vshrl.u32 %v719_v21, 7  ;;  %vm803_vm6 = vcmask 1045509   ;;  %v1835_v8 = vld [vmem:[#allocation8] sm:$0xff] (!%p1509_p11)  }
 0x121   : > { %676 = vadd.xlane.f32.xlu0 %v675_v3  ;;  %v700_v15 = vadd.f32 %v699_v11, %v621_v10  ;;  %vm805_vm7 = vcmask 1046534   ;;  %vm807_vm8 = vcmask 1047559   ;;  %v622_v3 = vld [vmem:[#allocation2] sm:$0xff]  ;;  %vm811_vm9 = vcmask 130048   ;;  %v1844_v21 = vld [vmem:[#allocation9 + $0x18] sm:$0xff] (!%p1509_p11)  }
 0x122   : > { %v695_v16 = vadd.f32 %v694_v14, %v617_v13  ;;  %v725_v25 = vadd.s32 4294967288, %v720_v24  ;;  %v723_v32 = vsub.s32 %v720_v24, %v722_v28  ;;  %vm2192_vm10 = vmmov (!%p1509_p11), 0   ;;  %v1847_v24 = vld [vmem:[#allocation9 + $0x28] sm:$0xff] (!%p1509_p11)  }
 0x123   : > { %vm1011_vm11 = vcmask (!%p1509_p11), 1045504   ;;  %vm1007_vm12 = vcmask (!%p1509_p11), 97280  }
 0x124   : > { %691 = vadd.xlane.f32.xlu1 %v690_v9  ;;  %v728_v29 = vsub.s32 %v725_v25, %v722_v28  ;;  %v2191_v9 = vmov (!%p1509_p11), 0.0   ;;  %v1840_v25 = vld [vmem:[#allocation11 + $0x10] sm:$0xff] (!%p1509_p11)  }
 0x125   : > { %686 = vadd.xlane.f32.xlu0 %v685_v12  ;;  %1587 = vmatprep.subr.bf16.mxu0 (!%p1509_p11), %v2191_v9  ;;  %v1836_v12 = vld [vmem:[%s2853_s29] sm:$0x3f] (!%p1509_p11)   ;;  %v1848_v28 = vld [vmem:[#allocation9 + $0x30] sm:$0xff] (!%p1509_p11)   ;;  %s2857_s29 = sld [smem:[#allocation33_spill]] (!%p1509_p11) }
 0x126   : > { %1593 = vmatprep.subr.bf16.mxu1 (!%p1509_p11), %v2191_v9  ;;  %1588 = vmatpush3.bf16.msra.mxu0 (!%p1509_p11), %v1835_v8  ;;  %v1013_v14 = vsel (!%p1509_p11), %vm1011_vm11, %v1836_v12, 0 }
 0x127   : > { %1589 = vmatprep.mubr.msk.bf16.mxu0 (!%p1509_p11), %vm2192_vm10, %v2191_v9  ;;  %1613 = vmatprep.subr.bf16.mxu0 (!%p1509_p11), %v2191_v9 }
 0x128   : > { %701 = vadd.xlane.f32.xlu1 %v700_v15  ;;  %1609 = vmatprep.mubr.msk.bf16.mxu1 (!%p1509_p11), %vm2192_vm10, %v2191_v9  ;;  %v1839_v15 = vld [vmem:[#allocation9] sm:$0xff] (!%p1509_p11)  }
 0x129   : > { %696 = vadd.xlane.f32.xlu0 %v695_v16  ;;  %v991_v16 = vld [vmem:[%s457_s30] sm:$0xff] (!%p1509_p11)  ;;  %1594 = vmatpush3.bf16.msra.mxu1 (!%p1509_p11), %v1839_v15 }
 0x12a   : > { %1595 = vmatprep.subr.bf16.mxu1 (!%p1509_p11), %v2191_v9 }
 0x199   : > { %v637_v17 = vpop.xlane.xlu1 %636 }
 0x19a   : > { %v627_v18 = vpop.xlane.xlu0 %626  ;;  %v735_v39 = vrot.slane %v637_v17, %v723_v32  ;;  %v1841_v17 = vld [vmem:[#allocation9 + $0x8] sm:$0xff] (!%p1509_p11)  }
 0x19b   : > { %v724_v40 = vrot.slane %v627_v18, %v723_v32  ;;  %v992_v18 = vpack.c.bf16 (!%p1509_p11), %v991_v16, %v991_v16  ;;  %1596 = vmatpush3.bf16.msra.mxu1 (!%p1509_p11), %v1841_v17 }
 0x19c   : > { %1597 = vmatprep.subr.bf16.mxu1 (!%p1509_p11), %v2191_v9 }
 0x19d   : > { %v642_v19 = vpop.xlane.xlu1 %641 }
 0x19e   : > { %v632_v20 = vpop.xlane.xlu0 %631  ;;  %v739_v33 = vrot.slane %v642_v19, %v728_v29  ;;  %v1837_v19 = vld [vmem:[#allocation11] sm:$0xff] (!%p1509_p11)  }
 0x19f   : > { %v729_v34 = vrot.slane %v632_v20, %v728_v29  ;;  %v1842_v20 = vld [vmem:[#allocation9 + $0x10] sm:$0xff] (!%p1509_p11)  }
 0x1a0   : > { %v740_v45 = vsel %vm730_vm1, %v739_v33, %v735_v39  ;;  %1598 = vmatpush3.bf16.msra.mxu1 (!%p1509_p11), %v1842_v20  ;;  %v1510_v33 = vld [vmem:[%s2854_s13] ss:$0 sm:$0xff] (!%p1509_p11) }
 0x1a1   : > { %v652_v22 = vpop.xlane.xlu1 %651  ;;  %v731_v46 = vsel %vm730_vm1, %v729_v34, %v724_v40  ;;  %1599 = vmatprep.subr.bf16.mxu1 (!%p1509_p11), %v2191_v9 }
 0x1a2   : > { %v647_v23 = vpop.xlane.xlu0 %646  ;;  %v748_v36 = vrot.slane %v652_v22, %v728_v29  ;;  %v796_v55 = vsel %vm795_vm2, %v740_v45, %v731_v46  ;;  %v1838_v22 = vld [vmem:[#allocation11 + $0x8] sm:$0xff] (!%p1509_p11)  }
 0x1a3   : > { %v744_v37 = vrot.slane %v647_v23, %v723_v32  ;;  %v1845_v23 = vld [vmem:[#allocation9 + $0x20] sm:$0xff] (!%p1509_p11)  }
 0x1a4   : > { %1600 = vmatpush3.bf16.msra.mxu1 (!%p1509_p11), %v1844_v21 }
 0x1a5   : > { %v662_v26 = vpop.xlane.xlu1 %661  ;;  %v749_v50 = vsel %vm730_vm1, %v748_v36, %v744_v37  ;;  %1601 = vmatprep.subr.bf16.mxu1 (!%p1509_p11), %v2191_v9 }
 0x1a6   : > { %v657_v27 = vpop.xlane.xlu0 %656  ;;  %v757_v41 = vrot.slane %v662_v26, %v728_v29  ;;  %v798_v57 = vsel %vm797_vm3, %v749_v50, %v796_v55  ;;  %v1843_v26 = vld [vmem:[#allocation11 + $0x18] sm:$0xff] (!%p1509_p11)  }
 0x1a7   : > { %v753_v42 = vrot.slane %v657_v27, %v723_v32  ;;  %v1846_v27 = vld [vmem:[#allocation11 + $0x20] sm:$0xff] (!%p1509_p11)  }
 0x1a8   : > { %1602 = vmatpush3.bf16.msra.mxu1 (!%p1509_p11), %v1845_v23 }
 0x1a9   : > { %v672_v30 = vpop.xlane.xlu1 %671  ;;  %v758_v53 = vsel %vm730_vm1, %v757_v41, %v753_v42  ;;  %1603 = vmatprep.subr.bf16.mxu1 (!%p1509_p11), %v2191_v9  ;;  %v1522_v41 = vld [vmem:[%s2855_s24] ss:$0 sm:$0xff] (!%p1509_p11) }
 0x1aa   : > { %v667_v31 = vpop.xlane.xlu0 %666  ;;  %v766_v43 = vrot.slane %v672_v30, %v728_v29  ;;  %v800_v60 = vsel %vm799_vm4, %v758_v53, %v798_v57  ;;  %v1850_v30 = vld [vmem:[#allocation9 + $0x38] sm:$0xff] (!%p1509_p11)  }
 0x1ab   : > { %v762_v44 = vrot.slane %v667_v31, %v723_v32  ;;  %v1851_v31 = vld [vmem:[#allocation11 + $0x30] sm:$0xff] (!%p1509_p11)  }
 0x1ac   : > { %1604 = vmatpush3.bf16.msra.mxu1 (!%p1509_p11), %v1847_v24 }
 0x1ad   : > { %v682_v35 = vpop.xlane.xlu1 %681  ;;  %v767_v56 = vsel %vm730_vm1, %v766_v43, %v762_v44  ;;  %1605 = vmatprep.subr.bf16.mxu1 (!%p1509_p11), %v2191_v9 }
 0x1ae   : > { %v677_v38 = vpop.xlane.xlu0 %676  ;;  %v775_v47 = vrot.slane %v682_v35, %v728_v29  ;;  %v802_v0 = vsel %vm801_vm5, %v767_v56, %v800_v60 }
 0x1af   : > { %v771_v48 = vrot.slane %v677_v38, %v723_v32 }
 0x1b0   : > { %1606 = vmatpush3.bf16.msra.mxu1 (!%p1509_p11), %v1848_v28 }
 0x1b1   : > { %v692_v49 = vpop.xlane.xlu1 %691  ;;  %v776_v58 = vsel %vm730_vm1, %v775_v47, %v771_v48  ;;  %1607 = vmatprep.subr.bf16.mxu1 (!%p1509_p11), %v2191_v9 }
 0x1b2   : > { %v784_v51 = vrot.slane %v692_v49, %v728_v29  ;;  %v687_v52 = vpop.xlane.xlu0 %686  ;;  %v804_v2 = vsel %vm803_vm6, %v776_v58, %v802_v0  ;;  %v1855_v0 = vld [vmem:[#allocation12 + $0x10] sm:$0xff] (!%p1509_p11)  }
 0x1b3   : > { %v780_v54 = vrot.slane %v687_v52, %v723_v32 }
 0x1b4   : > { %1608 = vmatpush3.bf16.msra.mxu1 (!%p1509_p11), %v1850_v30 }
 0x1b5   : > { %v702_v59 = vpop.xlane.xlu1 %701  ;;  %v785_v61 = vsel %vm730_vm1, %v784_v51, %v780_v54  ;;  %1639 = vmatprep.subr.bf16.mxu1 (!%p1509_p11), %v2191_v9 }
 0x1b6   : > { %v793_v62 = vrot.slane %v702_v59, %v728_v29  ;;  %v697_v63 = vpop.xlane.xlu0 %696  ;;  %v806_v4 = vsel %vm805_vm7, %v785_v61, %v804_v2  ;;  %v1849_v29 = vld [vmem:[#allocation11 + $0x28] sm:$0xff] (!%p1509_p11)   ;;  %v1857_v2 = vld [vmem:[#allocation12 + $0x20] sm:$0xff] (!%p1509_p11)  }
 0x1b7   : > { %v789_v1 = vrot.slane %v697_v63, %v723_v32  ;;  %816 = sbr.rel (%p1509_p11) target bundleno = 1496 (0x5d8), region = 96  ;;  %v1852_v32 = vld [vmem:[#allocation11 + $0x38] sm:$0xff] (!%p1509_p11)   ;;  %v1854_v63 = vld [vmem:[#allocation12 + $0x8] sm:$0xff] (!%p1509_p11)  }
 0x1b9   : > { %v794_v5 = vsel %vm730_vm1, %v793_v62, %v789_v1  ;;  %v1853_v62 = vld [vmem:[#allocation12] sm:$0xff] (!%p1509_p11)   ;;  %v1856_v1 = vld [vmem:[#allocation12 + $0x18] sm:$0xff] (!%p1509_p11)  }
 0x1ba   : > { %v808_v6 = vsel %vm807_vm8, %v794_v5, %v806_v4  ;;  %v1859_v4 = vld [vmem:[#allocation12 + $0x30] sm:$0xff] (!%p1509_p11)   ;;  %v1860_v5 = vld [vmem:[#allocation12 + $0x38] sm:$0xff] (!%p1509_p11)  }
 0x1bb   : > { %v810_v7 = vadd.f32 %v808_v6, %v622_v3  ;;  %v1858_v3 = vld [vmem:[#allocation12 + $0x28] sm:$0xff] (!%p1509_p11)  }
 0x1bd   : > { %812 = vst.msk [vmem:[#allocation2] sm:$0xff] %vm811_vm9, %v810_v7 }
 0x1c4   : > { %v817_v10 = vld [vmem:[#allocation2] sm:$0xff] }
 0x1c5   : > { %v818_v11 = vmul.f32 0.0009765625, %v817_v10 }
 0x1c7   : > { %v819_v13 = vpack.c.bf16 %v818_v11, %v818_v11 }
 0x1c9   : > { %1590 = vmatmul.mubr.msk.bf16.vlgmr.msra.gmra.mrb[0].mxu0 %vm811_vm9, %v819_v13 }
 0x1ca   : > { %1614 = vmatpush3.bf16.msra.mxu0 %v1013_v14  ;;  %1615 = vmatprep.mubr.msk.bf16.mxu0 %vm2192_vm10, %v2191_v9  ;;  %v1513_v14 = vld [vmem:[%s2856_s0] ss:$0 sm:$0xff] }
 0x1cb   : > { %1619 = vmatprep.subr.bf16.mxu0 %v2191_v9 }
 0x1d1   : > { %1616 = vmatmul.mubr.msk.bf16.vlgmr.msra.gmra.mrb[4].mxu0 %vm1007_vm12, %v992_v18 }
 0x1d2   : > { %1635 = vmatprep.mubr.msk.bf16.mxu0 %vm2192_vm10, %v2191_v9 }
 0x1d3   : > { %1620 = vmatpush3.bf16.xpose.msra.mxu0 %v1837_v19 }
 0x1d4   : > { %1621 = vmatprep.subr.bf16.mxu0 %v2191_v9 }
 0x1db   : > { %1622 = vmatpush3.bf16.xpose.msra.mxu0 %v1838_v22 }
 0x1dc   : > { %1623 = vmatprep.subr.bf16.mxu0 %v2191_v9 }
 0x1e3   : > { %1624 = vmatpush3.bf16.xpose.msra.mxu0 %v1840_v25 }
 0x1e4   : > { %1625 = vmatprep.subr.bf16.mxu0 %v2191_v9 }
 0x1eb   : > { %1626 = vmatpush3.bf16.xpose.msra.mxu0 %v1843_v26 }
 0x1ec   : > { %1627 = vmatprep.subr.bf16.mxu0 %v2191_v9 }
 0x1f3   : > { %1628 = vmatpush3.bf16.xpose.msra.mxu0 %v1846_v27 }
 0x1f4   : > { %1629 = vmatprep.subr.bf16.mxu0 %v2191_v9 }
 0x1fb   : > { %1630 = vmatpush3.bf16.xpose.msra.mxu0 %v1849_v29 }
 0x1fc   : > { %1631 = vmatprep.subr.bf16.mxu0 %v2191_v9 }
 0x203   : > { %1632 = vmatpush3.bf16.xpose.msra.mxu0 %v1851_v31 }
 0x204   : > { %1633 = vmatprep.subr.bf16.mxu0 %v2191_v9 }
 0x20b   : > { %1634 = vmatpush3.bf16.xpose.msra.mxu0 %v1852_v32 }
 0x29c   : > { %v872_v34 = vpop.f32.mrb[0].mxu0 }
 0x29d   : > { %v873_v35 = vadd.f32 %v1510_v33, %v872_v34  ;;  %v1591_v36 = vpop.f32.mrb[1].mxu0 }
 0x29e   : > { %v875_v37 = vpop.f32.mrb[2].mxu0 }
 0x29f   : > { %v878_v38 = vmax.f32 %v873_v35, 0.0  ;;  %v1592_v39 = vpop.f32.mrb[3].mxu0 }
 0x2a1   : > { %v879_v40 = vpack.c.bf16 %v878_v38, %v878_v38 }
 0x2a3   : > { %1610 = vmatmul.mubr.bf16.vlgmr.msra.gmra.mrb[0].mxu1 %v879_v40 }
 0x2a4   : > { %v1049_v42 = vpop.f32.mrb[4].mxu0  ;;  %1640 = vmatpush3.bf16.msra.mxu1 %v1837_v19  ;;  %1655 = vmatprep.mubr.msk.bf16.mxu1 %vm2192_vm10, %v2191_v9 }
 0x2a5   : > { %v1050_v43 = vadd.f32 %v1522_v41, %v1049_v42  ;;  %v1617_v44 = vpop.f32.mrb[5].mxu0  ;;  %1641 = vmatprep.subr.bf16.mxu1 %v2191_v9 }
 0x2a6   : > { %v1052_v45 = vpop.f32.mrb[6].mxu0 }
 0x2a7   : > { %1861 = vtanh.f32 %v1050_v43  ;;  %v1618_v46 = vpop.f32.mrb[7].mxu0 }
 0x2a8   : > { %1642 = vmatpush3.bf16.msra.mxu1 %v1838_v22 }
 0x2a9   : > { %1643 = vmatprep.subr.bf16.mxu1 %v2191_v9 }
 0x2ac   : > { %1644 = vmatpush3.bf16.msra.mxu1 %v1840_v25 }
 0x2ad   : > { %1645 = vmatprep.subr.bf16.mxu1 %v2191_v9 }
 0x2b0   : > { %1646 = vmatpush3.bf16.msra.mxu1 %v1843_v26 }
 0x2b1   : > { %v1862_v47 = vpop.eup %1861  ;;  %1647 = vmatprep.subr.bf16.mxu1 %v2191_v9 }
 0x2b2   : > { %v1072_v48 = vpack.c.bf16 %v1862_v47, %v1862_v47 }
 0x2b4   : > { %1636 = vmatmul.mubr.bf16.vlgmr.msra.gmra.mrb[8].mxu0 %v1072_v48  ;;  %1648 = vmatpush3.bf16.msra.mxu1 %v1846_v27 }
 0x2b5   : > { %1649 = vmatprep.subr.bf16.mxu1 %v2191_v9 }
 0x2b8   : > { %1650 = vmatpush3.bf16.msra.mxu1 %v1849_v29 }
 0x2b9   : > { %1651 = vmatprep.subr.bf16.mxu1 %v2191_v9 }
 0x2bc   : > { %1652 = vmatpush3.bf16.msra.mxu1 %v1851_v31 }
 0x2bd   : > { %1653 = vmatprep.subr.bf16.mxu1 %v2191_v9 }
 0x2c0   : > { %1654 = vmatpush3.bf16.msra.mxu1 %v1852_v32 }
 0x2c1   : > { %1659 = vmatprep.subr.bf16.mxu1 %v2191_v9 }
 0x376   : > { %v985_v49 = vpop.f32.mrb[0].mxu1 }
 0x377   : > { %v1611_v50 = vpop.f32.mrb[1].mxu1  ;;  %v986_v19 = vadd.f32 %v1513_v14, %v985_v49 }
 0x378   : > { %v988_v51 = vpop.f32.mrb[2].mxu1 }
 0x379   : > { %v1612_v52 = vpop.f32.mrb[3].mxu1 }
 0x387   : > { %v1155_v53 = vpop.f32.mrb[8].mxu0 }
 0x388   : > { %1161 = vmax.xlane.f32.xlu0 %v1155_v53  ;;  %v1637_v54 = vpop.f32.mrb[9].mxu0 }
 0x389   : > { %v1158_v55 = vpop.f32.mrb[10].mxu0 }
 0x38a   : > { %v1638_v56 = vpop.f32.mrb[11].mxu0 }
 0x415   : > { %v1162_v57 = vpop.xlane.xlu0 %1161 }
 0x416   : > { %v1163_v58 = vsub.f32 %v1155_v53, %v1162_v57 }
 0x418   : > { %v1164_v59 = vmul.f32 1.442695, %v1163_v58 }
 0x41a   : > { %1863 = vpow2.f32 %v1164_v59 }
 0x424   : > { %v1864_v60 = vpop.eup %1863 }
 0x425   : > { %1166 = vadd.xlane.f32.xlu0 %v1864_v60  ;;  %v1168_v61 = vpack.c.bf16 %v1864_v60, %v1864_v60 }
 0x427   : > { %1656 = vmatmul.mubr.bf16.vlgmr.msra.gmra.mrb[4].mxu1 %v1168_v61 }
 0x428   : > { %1675 = vmatprep.mubr.msk.bf16.mxu1 %vm2192_vm10, %v2191_v9  ;;  %1660 = vmatpush3.bf16.msra.mxu1 %v1853_v62 }
 0x429   : > { %1661 = vmatprep.subr.bf16.mxu1 %v2191_v9 }
 0x42c   : > { %1662 = vmatpush3.bf16.msra.mxu1 %v1854_v63 }
 0x42d   : > { %1663 = vmatprep.subr.bf16.mxu1 %v2191_v9 }
 0x430   : > { %1664 = vmatpush3.bf16.msra.mxu1 %v1855_v0 }
 0x431   : > { %1665 = vmatprep.subr.bf16.mxu1 %v2191_v9 }
 0x434   : > { %1666 = vmatpush3.bf16.msra.mxu1 %v1856_v1 }
 0x435   : > { %1667 = vmatprep.subr.bf16.mxu1 %v2191_v9 }
 0x438   : > { %1668 = vmatpush3.bf16.msra.mxu1 %v1857_v2 }
 0x439   : > { %1669 = vmatprep.subr.bf16.mxu1 %v2191_v9 }
 0x43c   : > { %1670 = vmatpush3.bf16.msra.mxu1 %v1858_v3 }
 0x43d   : > { %1671 = vmatprep.subr.bf16.mxu1 %v2191_v9 }
 0x440   : > { %1672 = vmatpush3.bf16.msra.mxu1 %v1859_v4 }
 0x441   : > { %1673 = vmatprep.subr.bf16.mxu1 %v2191_v9  ;;  %v1541_v9 = vld [vmem:[%s2857_s29] ss:$0 sm:$0xff] }
 0x444   : > { %1674 = vmatpush3.bf16.msra.mxu1 %v1860_v5 }
 0x4b2   : > { %v1167_v12 = vpop.xlane.xlu0 %1166 }
 0x4b3   : > { %1865 = vrcp.f32 %v1167_v12 }
 0x4bd   : > { %v1866_v13 = vpop.eup %1865 }
 0x4fa   : > { %v1203_v6 = vpop.f32.mrb[4].mxu1 }
 0x4fb   : > { %v1209_v7 = vpack.c.bf16 %v1203_v6, %v1203_v6  ;;  %v1657_v8 = vpop.f32.mrb[5].mxu1 }
 0x4fc   : > { %v1206_v10 = vpop.f32.mrb[6].mxu1 }
 0x4fd   : > { %v1658_v11 = vpop.f32.mrb[7].mxu1  ;;  %1676 = vmatmul.mubr.bf16.vlgmr.msra.gmra.mrb[8].mxu1 %v1209_v7 }
 0x5d0   : > { %v1308_v15 = vpop.f32.mrb[8].mxu1 }
 0x5d1   : > { %v1315_v16 = vmul.f32 %v1866_v13, %v1308_v15  ;;  %v1677_v17 = vpop.f32.mrb[9].mxu1 }
 0x5d2   : > { %v1311_v18 = vpop.f32.mrb[10].mxu1 }
 0x5d3   : > { %v1323_v20 = vadd.f32 %v1541_v9, %v1315_v16  ;;  %v1678_v21 = vpop.f32.mrb[11].mxu1 }
 0x5d5   : > { %v1324_v22 = vadd.f32 %v1323_v20, %v986_v19 }
 0x5d7   : > { %1325 = vst [vmem:[%s516_s7] sm:$0xff] %v1324_v22 }
 0x5d8 PF: > { %s2858_s23 = sld [smem:[#allocation22_spill]]  ;;  %s2859_s11 = sld [smem:[#allocation34_spill]] }
 0x5d9   : > { %s1340_s30 = sshll.u32 %s516_s7, 4  ;;  %s1327_s20 = scalar_lea.sflag [#allocation5], %s455_s2  ;;  %s1341_s30 = int_to_ptr.vmem [resolvable:$true] %s1340_s30 }
 0x5da   : > { %s2039_s0 = scalar_lea.vmem %s1341_s30, 128  ;;  %p2860_p10 = scmp.ne.s32.totalorder %s2837_s16, 0 }
 0x5db   : > { %p2040_p13 = scmp.ne.s32.totalorder %s1341_s30, %s2039_s0  ;;  %s2193_s28 = smov [#allocation14]  }
 0x5dc   : > { %s2043_s8 = sshll.u32 %s2193_s28, 4  ;;  %s2044_s8 = int_to_ptr.vmem [resolvable:$false] %s2043_s8 }
 0x5dd   : > { %p2041_p4 = pnand %p2040_p13, %p2860_p10  ;;  %s2045_s29 = scalar_lea.vmem %s2044_s8, 256 }
 0x5de   : > { %s1543_s5 = sshll.u32 %s2858_s23, 7  ;;  %p2046_p6 = scmp.lt.s32.totalorder %s1341_s30, %s2044_s8 }
 0x5df   : > { %s2730_s24 = scalar_lea.hbm %s2859_s11, %s1543_s5  ;;  %p2042_p12 = pneg %p2041_p4 }
 0x5e0   : > { %p2047_p9 = scmp.lt.s32.totalorder %s2045_s29, %s2039_s0 }
 0x5e2   : > { %p2048_p2 = por %p2047_p9, %p2046_p6 }
 0x5e4   : > { %p2049_p8 = pnand %p2048_p2, %p2042_p12 }
 0x5e6   : > { %2052 = shalt.err (!%p2049_p8)
}
 0x5e7   : > { %s2053_s2 = scalar_lea.hbm %s2730_s24, 128  ;;  %s2057_s23 = scalar_lea.hbm %s2859_s11, 256 }
 0x5e8   : > { %p2054_p1 = scmp.ne.s32.totalorder %s2730_s24, %s2053_s2  ;;  %p2058_p5 = scmp.lt.u32.totalorder %s2730_s24, %s2859_s11 }
 0x5e9   : > { %p2059_p7 = scmp.lt.u32.totalorder %s2057_s23, %s2053_s2  ;;  %p2061_p13 = scmp.lt.u32.totalorder %s2053_s2, %s2730_s24 }
 0x5ea   : > { %p2055_p0 = pnand %p2054_p1, %p2860_p10 }
 0x5eb   : > { %p2060_p11 = por %p2059_p7, %p2058_p5 }
 0x5ec   : > { %p2056_p3 = pneg %p2055_p0 }
 0x5ed   : > { %p2062_p4 = por %p2061_p13, %p2060_p11 }
 0x5ef   : > { %p2063_p12 = pnand %p2062_p4, %p2056_p3 }
 0x5f1   : > { %2066 = shalt.err (!%p2063_p12)
}
 0x5f2   : > { %1699 = dma.vmem_to_hbm [thread:$0]  (%p2860_p10), %s1341_s30, 128, %s2730_s24, %s1327_s20  }
 0x5f3 PF: > { %p1734_p6 = scmp.ge.s32.totalorder %s2177_s27, 2  ;;  %s1352_s10 = sand.u32 1, %s2137_s17  }
 0x5f4   : > { %p2861_p9 = scmp.ne.s32.totalorder %s2838_s12, 0  ;;  %s1353_s0 = scalar_lea.sflag [#allocation5], %s1352_s10 }
 0x5f6   : > { %p1722_p2 = pnand %p1734_p6, %p2861_p9 }
 0x5f8   : > { %2132 = dma.done.wait (!%p1722_p2), %s1353_s0, 128  }
 0x5f9   : > { %2134 = vsyncadd (!%p1722_p2), %s1353_s0, 4294967168  ;;  %s32_s27 = sadd.s32 1, %s2177_s27   ;;  %s2862_s17 = smov %s2141_s18 }
 0x5fa   : > { %p29_p8 = scmp.ge.s32.totalorder %s32_s27, 6   ;;  %s2863_s18 = smov %s2145_s19 }
 0x5fb   : > { %s2864_s19 = smov %s2523_s15  ;;  %s2865_s20 = smov %s2153_s21 }
 0x5fc   : > { %s2866_s21 = smov %s2157_s22  ;;  %s2867_s22 = smov %s2470_s6 }
 0x5fd   : > { %s2868_s23 = smov %s2169_s25  ;;  %s2869_s24 = smov %s2173_s26 }
 0x5fe   : > { %s2870_s25 = smov %s2873_s3  ;;  %s2871_s26 = smov %s2877_s14 }
 0x5ff   :  { %31 = sbr.rel (!%p29_p8) target bundleno = 24 (0x18), region = 146 }
 0x606   :  { %1358 = vsyncpa [#allocation4], 1 }
 0x607   :  { %1360 = vsyncpa [#allocation4 + $0x1], 1 }
 0x608   :  { %1361 = vsyncpa [#allocation7], 1 }
 0x609   :  { %1363 = vsyncpa [#allocation7 + $0x1], 1 }
 0x60a   :  { %1364 = vsyncpa [#allocation10], 1 }
 0x60b   :  { %1365 = vsyncpa [#allocation13], 1 }
 0x60c   :  { %1366 = vsyncpa [#allocation5], 1 }
 0x60d   :  { %1368 = vsyncpa [#allocation5 + $0x1], 1 }

</bundles_post_ra>
